<compile_context>
chip_gen: v6e
topology: v6e:2x2x1
jax: 0.10.0
libtpu: 0.0.40
codegen_flags: <defaults>
</compile_context>

<pallas_src>
import functools

import jax
import jax.numpy as jnp
from jax.experimental import pallas as pl
from jax.experimental.pallas import tpu as pltpu


# ----------------------------------------------------------------------------
# Host-side weight packing helpers (run once under jit, outside the kernel).
# ----------------------------------------------------------------------------
def _block_diag(w, fold):
    """(k, n) -> (fold*k, fold*n) block-diagonal replication of w."""
    if fold == 1:
        return w
    k, n = w.shape
    eye = jnp.eye(fold, dtype=w.dtype)
    return (eye[:, None, :, None] * w[None, :, None, :]).reshape(fold * k, fold * n)


def _tile_lanes(p, fold):
    """Per-channel vector (*, c) -> lane-folded row (1, fold*c)."""
    return jnp.tile(p.reshape(-1), fold).reshape(1, -1)


# ----------------------------------------------------------------------------
# Pallas kernel: fused  out = GPFCA(x) + x * scale  on one (1, S1, S2, C4) block.
# C4 = fold*c is lane-dense (128 lanes for c=32).  seq_axis (0=time, 1=freq
# after squeezing batch) is fully resident, so the SE pooling is exact.
# ----------------------------------------------------------------------------
def _gpfca_scale_kernel(x_ref, dyt_a_ref, dyt_w_ref, dyt_b_ref,
                        w1_ref, w2_ref, wr_ref, we_ref, rs_ref,
                        out_ref, *, seq_axis, nh):
    x = x_ref[0].astype(jnp.float32)                       # (S1, S2, C4), lane-dense
    s1, s2, c4 = x.shape
    rows = s1 * s2

    # ---- DyT normalization: tanh(alpha*x)*w + b  (f32 VPU/EUP, lane-dense) ---
    y = (jnp.tanh(dyt_a_ref[...].reshape(1, 1, c4) * x)
         * dyt_w_ref[...].reshape(1, 1, c4) + dyt_b_ref[...].reshape(1, 1, c4))

    # ---- SwiGLU MLP: ONE fused gate|value dot (K=128, N=4*2H), bf16 in / f32 acc
    y2 = y.reshape(rows, c4).astype(jnp.bfloat16)
    p = jnp.dot(y2, w1_ref[...], preferred_element_type=jnp.float32)   # (rows, 2*nh)
    g = p[:, :nh]                        # nh is a multiple of 128 when folded
    v = p[:, nh:]                        #   -> vreg-aligned split (no mid-vreg slice)
    h = (v * (g * jax.nn.sigmoid(g))).astype(jnp.bfloat16)             # v * silu(g)
    z = jnp.dot(h, w2_ref[...], preferred_element_type=jnp.float32)    # (rows, C4)
    z3 = z.reshape(s1, s2, c4)

    # ---- Squeeze-Excitation over the fully-resident sequence axis -------------
    # (The tiled grid axis is never the pooling axis, so ragged last tiles can't
    # contaminate the pool.  For the freq pass the cross-lane-group part of the
    # f-mean is folded into wr by the wrapper.)
    pooled = jnp.mean(z3, axis=seq_axis)                               # (S_other, C4)
    e = jnp.maximum(jnp.dot(pooled.astype(jnp.bfloat16), wr_ref[...],
                            preferred_element_type=jnp.float32), 0.0)
    se = jax.nn.sigmoid(jnp.dot(e.astype(jnp.bfloat16), we_ref[...],
                                preferred_element_type=jnp.float32))   # (S_other, C4)
    se = jnp.expand_dims(se, seq_axis)

    # ---- GPFCA residual + TS_BLOCK scale fused: z*se + x + x*s = z*se + x*(1+s)
    out_ref[0] = (z3 * se + x * rs_ref[...].reshape(1, 1, c4)).astype(out_ref.dtype)


# ----------------------------------------------------------------------------
# VMEM sizing.
# ----------------------------------------------------------------------------
def _vmem_budget_bytes():
    """~60% of physical VMEM (conservative for v7x's 64 MiB); safe fallback."""
    cap = 64 * 1024 * 1024
    try:
        cap = int(pltpu.get_tpu_info().vmem_capacity_bytes)
    except Exception:
        pass
    return (cap * 3) // 5


def _choose_tile(seq_len, other_len, batch, c4, nh, in_bytes, out_bytes,
                 vmem_budget, tiled_is_sublane, align):
    """Largest tile of the non-sequence axis whose block + live temps fit VMEM."""
    # Per-(folded)-row footprint: double-buffered in/out blocks plus the
    # simultaneously-live f32/bf16 temporaries of the body.
    per_row = (c4 * (2 * in_bytes + 2 * out_bytes)   # in/out blocks, 2 buffers each
               + c4 * (4 * 4 + 2)                    # x, y, z, out (f32) + y bf16
               + nh * (2 * 4 + 2 + 4))               # p = g|v (f32), h bf16 (+f32 tmp)
    budget = max(vmem_budget - (4 << 20), 2 << 20)   # weights / sems / slack
    rows_cap = max(budget // per_row, 1)
    tile = int(max(1, min(other_len, rows_cap // max(seq_len, 1))))
    if tile < other_len:
        if other_len >= align:
            tile = min(other_len, max(align, (tile // align) * align))
        else:
            tile = other_len
    # TODO(synk): if even the minimal aligned tile exceeds the budget (very long
    # sequences on v7x), switch to a two-phase SE instead of requiring the full
    # sequence resident.
    # Keep >= 2 grid steps so a dual-TC part (v7x) never idles one core.
    if batch * pl.cdiv(other_len, tile) < 2:
        half = other_len // 2
        if tiled_is_sublane:
            half = (half // align) * align
        if half >= 1:
            tile = half
    return tile


# ----------------------------------------------------------------------------
# One GPFCA + residual-scale pass over lane-folded channels-last activations
# x4: (b, t, f//fold, fold*c).
#   seq_axis = 1 -> sequence along t (time pass), tiles along folded-f
#   seq_axis = 2 -> sequence along f (freq pass), tiles along t
# ----------------------------------------------------------------------------
def gpfca_plus_scale(x4, params, scale, *, seq_axis, c, fold, out_dtype=None):
    assert seq_axis in (1, 2)
    b, t, f4, c4 = x4.shape
    assert c4 == fold * c
    hidden = params["w1_gate"].shape[1]
    nh = fold * hidden
    out_dtype = out_dtype or x4.dtype
    vmem_budget = _vmem_budget_bytes()

    in_bytes = jnp.dtype(x4.dtype).itemsize
    out_bytes = jnp.dtype(out_dtype).itemsize

    if seq_axis == 1:
        seq_len, other_len = t, f4
        tiled_is_sublane = True          # tiled dim is the block's 2nd-to-last dim
    else:
        seq_len, other_len = f4, t
        tiled_is_sublane = False
    # bf16 output packs sublane rows in pairs -> 16-align the sublane tile.
    align = 16 if (tiled_is_sublane and out_bytes == 2) else 8
    tile = _choose_tile(seq_len, other_len, b, c4, nh, in_bytes, out_bytes,
                        vmem_budget, tiled_is_sublane, align)

    if seq_axis == 1:
        block = (1, t, tile, c4)
        idx_map = lambda i, j: (i, 0, j, 0)
    else:
        block = (1, tile, f4, c4)
        idx_map = lambda i, j: (i, j, 0, 0)
    grid = (b, pl.cdiv(other_len, tile))

    f32, bf16 = jnp.float32, jnp.bfloat16
    # Lane-folded DyT params and fused residual scale (1 + beta/gamma), hoisted once.
    dyt_a = _tile_lanes(params["dyt_a"].astype(f32), fold)
    dyt_w = _tile_lanes(params["dyt_w"].astype(f32), fold)
    dyt_b = _tile_lanes(params["dyt_b"].astype(f32), fold)
    rscale = _tile_lanes(1.0 + scale.astype(f32), fold)
    # Fused gate|value projection and block-diagonal lane-folded weights (bf16 MXU,
    # f32 accumulation in-kernel).
    w1 = jnp.concatenate([_block_diag(params["w1_gate"], fold),
                          _block_diag(params["w1_val"], fold)], axis=1).astype(bf16)
    w2 = _block_diag(params["w2"], fold).astype(bf16)
    if seq_axis == 1:
        # Pool over t only: independent SE per folded-f lane group.
        wr = _block_diag(params["wr"], fold).astype(bf16)
    else:
        # Pool over f: fold the cross-lane-group mean (sum/fold) into wr so the
        # kernel's plain in-block mean + dot is exact and se comes out replicated
        # per lane group (the correct f-broadcast).
        wr = (jnp.tile(params["wr"], (fold, fold)) * (1.0 / fold)).astype(bf16)
    we = _block_diag(params["we"], fold).astype(bf16)

    param_arrays = (dyt_a, dyt_w, dyt_b, w1, w2, wr, we, rscale)
    x_spec = pl.BlockSpec(block, idx_map)
    # Constant block index -> Pallas fetches each parameter only once.
    param_specs = [pl.BlockSpec(p.shape, lambda i, j: (0, 0)) for p in param_arrays]

    kernel = functools.partial(_gpfca_scale_kernel, seq_axis=seq_axis - 1, nh=nh)
    return pl.pallas_call(
        kernel,
        out_shape=jax.ShapeDtypeStruct((b, t, f4, c4), out_dtype),
        grid_spec=pltpu.PrefetchScalarGridSpec(
            num_scalar_prefetch=0,
            grid=grid,
            in_specs=[x_spec] + param_specs,
            out_specs=pl.BlockSpec(block, idx_map),
        ),
        compiler_params=pltpu.CompilerParams(
            dimension_semantics=("parallel", "parallel"),
            vmem_limit_bytes=int(vmem_budget),
        ),
    )(x4, *param_arrays)


# ----------------------------------------------------------------------------
# TS_BLOCK forward.  Both passes share one lane-folded channels-last layout;
# only the entry/exit NCHW<->NHWC transposes remain in XLA (see TODO above).
# ----------------------------------------------------------------------------
def ts_block_forward(x, params, *, interpass_dtype=jnp.bfloat16):
    """x: (b, c, t, f) with c == dense_channel (matches the PyTorch NCHW input)."""
    b, c, t, f = x.shape
    fold = 128 // c if (128 % c == 0 and f % max(128 // c, 1) == 0) else 1
    xt = jnp.transpose(x, (0, 2, 3, 1))                      # (b, t, f, c)
    x4 = xt.reshape(b, t, f // fold, fold * c)               # free lane-dense fold
    x4 = gpfca_plus_scale(x4, params["time"], params["beta"],
                          seq_axis=1, c=c, fold=fold, out_dtype=interpass_dtype)
    x4 = gpfca_plus_scale(x4, params["freq"], params["gamma"],
                          seq_axis=2, c=c, fold=fold, out_dtype=x.dtype)
    xf = x4.reshape(b, t, f, c)
    return jnp.transpose(xf, (0, 3, 1, 2))                   # (b, c, t, f)


# ----------------------------------------------------------------------------
# Pure-JAX (f32, unfolded) reference of the same math, for a sanity check.
# ----------------------------------------------------------------------------
def _gpfca_ref(x, p, scale, seq_axis):
    c = x.shape[-1]
    y = (jnp.tanh(p["dyt_a"].reshape(1, 1, 1, c) * x)
         * p["dyt_w"].reshape(1, 1, 1, c) + p["dyt_b"].reshape(1, 1, 1, c))
    g = jnp.einsum("btfc,ch->btfh", y, p["w1_gate"])
    v = jnp.einsum("btfc,ch->btfh", y, p["w1_val"])
    h = v * (g * jax.nn.sigmoid(g))
    z = jnp.einsum("btfh,hc->btfc", h, p["w2"])
    pooled = jnp.mean(z, axis=seq_axis, keepdims=True)
    e = jnp.maximum(jnp.einsum("btfc,cr->btfr", pooled, p["wr"]), 0.0)
    s = jax.nn.sigmoid(jnp.einsum("btfr,rc->btfc", e, p["we"]))
    return (z * s + x) + x * scale.reshape(1, 1, 1, c)


def ts_block_ref(x, params):
    xt = jnp.transpose(x, (0, 2, 3, 1))
    xt = _gpfca_ref(xt, params["time"], params["beta"], seq_axis=1)
    xf = _gpfca_ref(xt, params["freq"], params["gamma"], seq_axis=2)
    return jnp.transpose(xf, (0, 3, 1, 2))


# ----------------------------------------------------------------------------
# Deterministic parameter initialization.
# ----------------------------------------------------------------------------
def init_gpfca_params(key, c, hidden_mult=2, se_ratio=4):
    hidden = hidden_mult * c
    k1, k2, k3, k4, k5 = jax.random.split(key, 5)
    return {
        "dyt_a": jnp.full((1, c), 0.5, jnp.float32),           # DyT alpha
        "dyt_w": jnp.ones((1, c), jnp.float32),                # DyT scale
        "dyt_b": jnp.zeros((1, c), jnp.float32),               # DyT shift
        "w1_gate": jax.random.normal(k1, (c, hidden), jnp.float32) / jnp.sqrt(c),
        "w1_val": jax.random.normal(k2, (c, hidden), jnp.float32) / jnp.sqrt(c),
        "w2": jax.random.normal(k3, (hidden, c), jnp.float32) / jnp.sqrt(hidden),
        "wr": jax.random.normal(k4, (c, c // se_ratio), jnp.float32) / jnp.sqrt(c),
        "we": jax.random.normal(k5, (c // se_ratio, c), jnp.float32)
              / jnp.sqrt(c // se_ratio),
    }


def init_ts_block_params(key, dense_channel):
    kt, kf = jax.random.split(key)
    return {
        "time": init_gpfca_params(kt, dense_channel),
        "freq": init_gpfca_params(kf, dense_channel),
        # nn.Parameter(torch.zeros((1,1,1,C))) -> stored flattened as (1, C)
        "beta": jnp.zeros((1, dense_channel), jnp.float32),
        "gamma": jnp.zeros((1, dense_channel), jnp.float32),
    }


if __name__ == "__main__":
    dense_channel = 32
    b, t, f = 2, 16, 16

    key = jax.random.PRNGKey(0)
    k_x, k_p = jax.random.split(key)
    x = jax.random.normal(k_x, (b, dense_channel, t, f), jnp.float32)
    params = init_ts_block_params(k_p, dense_channel)

    out = jax.jit(ts_block_forward)(x, params)
    out = jax.block_until_ready(out)
    assert out.shape == (b, dense_channel, t, f)
    assert bool(jnp.all(jnp.isfinite(out)))

    # Loose tolerance: kernel uses bf16 MXU operands and bf16 inter-pass
    # activations; reference is full f32.
    ref = jax.jit(ts_block_ref)(x, params)
    max_err = float(jnp.max(jnp.abs(out - ref)))
    assert max_err < 0.25, max_err

    print("KERNEL_OK")
</pallas_src>

<mosaic_0001>
module attributes {stable_mosaic.version = 11 : i64} {
  func.func @_gpfca_scale_kernel(%arg0: i32, %arg1: i32, %arg2: memref<1x16x4x128xf32, #tpu.memory_space<vmem>>, %arg3: memref<1x128xf32, #tpu.memory_space<vmem>>, %arg4: memref<1x128xf32, #tpu.memory_space<vmem>>, %arg5: memref<1x128xf32, #tpu.memory_space<vmem>>, %arg6: memref<128x512xbf16, #tpu.memory_space<vmem>>, %arg7: memref<256x128xbf16, #tpu.memory_space<vmem>>, %arg8: memref<128x32xbf16, #tpu.memory_space<vmem>>, %arg9: memref<32x128xbf16, #tpu.memory_space<vmem>>, %arg10: memref<1x128xf32, #tpu.memory_space<vmem>>, %arg11: memref<1x16x4x128xbf16, #tpu.memory_space<vmem>>) attributes {dimension_semantics = [#tpu.dimension_semantics<parallel>, #tpu.dimension_semantics<parallel>], iteration_bounds = array<i64: 2, 1>, scalar_prefetch = 0 : i64, scratch_operands = 0 : i64, tpu.core_type = #tpu.core_type<tc>, window_params = [{transform_indices = @transform_0, window_bounds = array<i64: 1, 16, 4, 128>}, {pipeline_mode = #tpu.pipeline_mode<synchronous>, transform_indices = @transform_1, window_bounds = array<i64: 1, 128>}, {pipeline_mode = #tpu.pipeline_mode<synchronous>, transform_indices = @transform_2, window_bounds = array<i64: 1, 128>}, {pipeline_mode = #tpu.pipeline_mode<synchronous>, transform_indices = @transform_3, window_bounds = array<i64: 1, 128>}, {pipeline_mode = #tpu.pipeline_mode<synchronous>, transform_indices = @transform_4, window_bounds = array<i64: 128, 512>}, {pipeline_mode = #tpu.pipeline_mode<synchronous>, transform_indices = @transform_5, window_bounds = array<i64: 256, 128>}, {pipeline_mode = #tpu.pipeline_mode<synchronous>, transform_indices = @transform_6, window_bounds = array<i64: 128, 32>}, {pipeline_mode = #tpu.pipeline_mode<synchronous>, transform_indices = @transform_7, window_bounds = array<i64: 32, 128>}, {pipeline_mode = #tpu.pipeline_mode<synchronous>, transform_indices = @transform_8, window_bounds = array<i64: 1, 128>}, {transform_indices = @transform_9, window_bounds = array<i64: 1, 16, 4, 128>}]} {
    %c0 = arith.constant 0 : index
    %c0_0 = arith.constant 0 : index
    %c0_1 = arith.constant 0 : index
    %c0_2 = arith.constant 0 : index
    %0 = vector.load %arg2[%c0, %c0_0, %c0_1, %c0_2] : memref<1x16x4x128xf32, #tpu.memory_space<vmem>>, vector<1x16x4x128xf32>
    %1 = vector.shape_cast %0 : vector<1x16x4x128xf32> to vector<16x4x128xf32>
    %c0_3 = arith.constant 0 : index
    %c0_4 = arith.constant 0 : index
    %2 = vector.load %arg3[%c0_3, %c0_4] : memref<1x128xf32, #tpu.memory_space<vmem>>, vector<1x128xf32>
    %3 = vector.shape_cast %2 : vector<1x128xf32> to vector<1x1x128xf32>
    %4 = vector.broadcast %3 : vector<1x1x128xf32> to vector<16x4x128xf32>
    %5 = arith.mulf %4, %1 : vector<16x4x128xf32>
    %6 = math.tanh %5 : vector<16x4x128xf32>
    %c0_5 = arith.constant 0 : index
    %c0_6 = arith.constant 0 : index
    %7 = vector.load %arg4[%c0_5, %c0_6] : memref<1x128xf32, #tpu.memory_space<vmem>>, vector<1x128xf32>
    %8 = vector.shape_cast %7 : vector<1x128xf32> to vector<1x1x128xf32>
    %9 = vector.broadcast %8 : vector<1x1x128xf32> to vector<16x4x128xf32>
    %10 = arith.mulf %6, %9 : vector<16x4x128xf32>
    %c0_7 = arith.constant 0 : index
    %c0_8 = arith.constant 0 : index
    %11 = vector.load %arg5[%c0_7, %c0_8] : memref<1x128xf32, #tpu.memory_space<vmem>>, vector<1x128xf32>
    %12 = vector.shape_cast %11 : vector<1x128xf32> to vector<1x1x128xf32>
    %13 = vector.broadcast %12 : vector<1x1x128xf32> to vector<16x4x128xf32>
    %14 = arith.addf %10, %13 : vector<16x4x128xf32>
    %15 = vector.shape_cast %14 : vector<16x4x128xf32> to vector<64x128xf32>
    %16 = arith.truncf %15 : vector<64x128xf32> to vector<64x128xbf16>
    %c0_9 = arith.constant 0 : index
    %c0_10 = arith.constant 0 : index
    %17 = vector.load %arg6[%c0_9, %c0_10] : memref<128x512xbf16, #tpu.memory_space<vmem>>, vector<128x512xbf16>
    %cst = arith.constant dense<0.000000e+00> : vector<64x512xf32>
    %18 = tpu.matmul %16, %17, %cst {dimension_numbers = #tpu.dot_dimension_numbers<[1], [0], [0], [1], [0, 0, 1, 1], [], []>} : vector<64x128xbf16>, vector<128x512xbf16>, vector<64x512xf32> -> vector<64x512xf32>
    %19 = vector.extract_strided_slice %18 {offsets = [0, 0], sizes = [64, 256], strides = [1, 1]} : vector<64x512xf32> to vector<64x256xf32>
    %20 = vector.extract_strided_slice %18 {offsets = [0, 256], sizes = [64, 256], strides = [1, 1]} : vector<64x512xf32> to vector<64x256xf32>
    %21 = arith.negf %19 : vector<64x256xf32>
    %22 = math.exp %21 : vector<64x256xf32>
    %cst_11 = arith.constant 1.000000e+00 : f32
    %23 = vector.broadcast %cst_11 : f32 to vector<64x256xf32>
    %24 = arith.addf %23, %22 : vector<64x256xf32>
    %25 = arith.divf %23, %24 : vector<64x256xf32>
    %26 = arith.mulf %19, %25 : vector<64x256xf32>
    %27 = arith.mulf %20, %26 : vector<64x256xf32>
    %28 = arith.truncf %27 : vector<64x256xf32> to vector<64x256xbf16>
    %c0_12 = arith.constant 0 : index
    %c0_13 = arith.constant 0 : index
    %29 = vector.load %arg7[%c0_12, %c0_13] : memref<256x128xbf16, #tpu.memory_space<vmem>>, vector<256x128xbf16>
    %cst_14 = arith.constant dense<0.000000e+00> : vector<64x128xf32>
    %30 = tpu.matmul %28, %29, %cst_14 {dimension_numbers = #tpu.dot_dimension_numbers<[1], [0], [0], [1], [0, 0, 1, 1], [], []>} : vector<64x256xbf16>, vector<256x128xbf16>, vector<64x128xf32> -> vector<64x128xf32>
    %31 = vector.shape_cast %30 : vector<64x128xf32> to vector<16x4x128xf32>
    %cst_15 = arith.constant dense<0.000000e+00> : vector<4x128xf32>
    %32 = vector.multi_reduction <add>, %31, %cst_15 [0] : vector<16x4x128xf32> to vector<4x128xf32>
    %cst_16 = arith.constant 1.600000e+01 : f32
    %33 = vector.broadcast %cst_16 : f32 to vector<4x128xf32>
    %34 = arith.divf %32, %33 : vector<4x128xf32>
    %35 = arith.truncf %34 : vector<4x128xf32> to vector<4x128xbf16>
    %c0_17 = arith.constant 0 : index
    %c0_18 = arith.constant 0 : index
    %36 = vector.load %arg8[%c0_17, %c0_18] : memref<128x32xbf16, #tpu.memory_space<vmem>>, vector<128x32xbf16>
    %cst_19 = arith.constant dense<0.000000e+00> : vector<4x32xf32>
    %37 = tpu.matmul %35, %36, %cst_19 {dimension_numbers = #tpu.dot_dimension_numbers<[1], [0], [0], [1], [0, 0, 1, 1], [], []>} : vector<4x128xbf16>, vector<128x32xbf16>, vector<4x32xf32> -> vector<4x32xf32>
    %cst_20 = arith.constant 0.000000e+00 : f32
    %38 = vector.broadcast %cst_20 : f32 to vector<4x32xf32>
    %39 = arith.maximumf %37, %38 : vector<4x32xf32>
    %40 = arith.truncf %39 : vector<4x32xf32> to vector<4x32xbf16>
    %c0_21 = arith.constant 0 : index
    %c0_22 = arith.constant 0 : index
    %41 = vector.load %arg9[%c0_21, %c0_22] : memref<32x128xbf16, #tpu.memory_space<vmem>>, vector<32x128xbf16>
    %cst_23 = arith.constant dense<0.000000e+00> : vector<4x128xf32>
    %42 = tpu.matmul %40, %41, %cst_23 {dimension_numbers = #tpu.dot_dimension_numbers<[1], [0], [0], [1], [0, 0, 1, 1], [], []>} : vector<4x32xbf16>, vector<32x128xbf16>, vector<4x128xf32> -> vector<4x128xf32>
    %43 = arith.negf %42 : vector<4x128xf32>
    %44 = math.exp %43 : vector<4x128xf32>
    %cst_24 = arith.constant 1.000000e+00 : f32
    %45 = vector.broadcast %cst_24 : f32 to vector<4x128xf32>
    %46 = arith.addf %45, %44 : vector<4x128xf32>
    %47 = arith.divf %45, %46 : vector<4x128xf32>
    %48 = vector.shape_cast %47 : vector<4x128xf32> to vector<1x4x128xf32>
    %49 = vector.broadcast %48 : vector<1x4x128xf32> to vector<16x4x128xf32>
    %50 = arith.mulf %31, %49 : vector<16x4x128xf32>
    %c0_25 = arith.constant 0 : index
    %c0_26 = arith.constant 0 : index
    %51 = vector.load %arg10[%c0_25, %c0_26] : memref<1x128xf32, #tpu.memory_space<vmem>>, vector<1x128xf32>
    %52 = vector.shape_cast %51 : vector<1x128xf32> to vector<1x1x128xf32>
    %53 = vector.broadcast %52 : vector<1x1x128xf32> to vector<16x4x128xf32>
    %54 = arith.mulf %1, %53 : vector<16x4x128xf32>
    %55 = arith.addf %50, %54 : vector<16x4x128xf32>
    %56 = arith.truncf %55 : vector<16x4x128xf32> to vector<16x4x128xbf16>
    %c0_27 = arith.constant 0 : index
    %c0_28 = arith.constant 0 : index
    %c0_29 = arith.constant 0 : index
    %c0_30 = arith.constant 0 : index
    %57 = vector.load %arg11[%c0_27, %c0_28, %c0_29, %c0_30] : memref<1x16x4x128xbf16, #tpu.memory_space<vmem>>, vector<1x16x4x128xbf16>
    %58 = vector.shape_cast %57 : vector<1x16x4x128xbf16> to vector<16x4x128xbf16>
    %59 = vector.shape_cast %56 : vector<16x4x128xbf16> to vector<1x16x4x128xbf16>
    tpu.vector_store %arg11[%c0_27, %c0_28, %c0_29, %c0_30], %59 {strides = array<i32>} : memref<1x16x4x128xbf16, #tpu.memory_space<vmem>>, vector<1x16x4x128xbf16>,
    return
  }
  func.func @transform_0(%arg0: i32, %arg1: i32) -> (i32, i32, i32, i32) {
    %c0_i32 = arith.constant 0 : i32
    %c0_i32_0 = arith.constant 0 : i32
    %c0_i32_1 = arith.constant 0 : i32
    return %arg0, %c0_i32, %arg1, %c0_i32_0 : i32, i32, i32, i32
  }
  func.func @transform_1(%arg0: i32, %arg1: i32) -> (i32, i32) {
    %c0_i32 = arith.constant 0 : i32
    %c0_i32_0 = arith.constant 0 : i32
    %c0_i32_1 = arith.constant 0 : i32
    return %c0_i32, %c0_i32_0 : i32, i32
  }
  func.func @transform_2(%arg0: i32, %arg1: i32) -> (i32, i32) {
    %c0_i32 = arith.constant 0 : i32
    %c0_i32_0 = arith.constant 0 : i32
    %c0_i32_1 = arith.constant 0 : i32
    return %c0_i32, %c0_i32_0 : i32, i32
  }
  func.func @transform_3(%arg0: i32, %arg1: i32) -> (i32, i32) {
    %c0_i32 = arith.constant 0 : i32
    %c0_i32_0 = arith.constant 0 : i32
    %c0_i32_1 = arith.constant 0 : i32
    return %c0_i32, %c0_i32_0 : i32, i32
  }
  func.func @transform_4(%arg0: i32, %arg1: i32) -> (i32, i32) {
    %c0_i32 = arith.constant 0 : i32
    %c0_i32_0 = arith.constant 0 : i32
    %c0_i32_1 = arith.constant 0 : i32
    return %c0_i32, %c0_i32_0 : i32, i32
  }
  func.func @transform_5(%arg0: i32, %arg1: i32) -> (i32, i32) {
    %c0_i32 = arith.constant 0 : i32
    %c0_i32_0 = arith.constant 0 : i32
    %c0_i32_1 = arith.constant 0 : i32
    return %c0_i32, %c0_i32_0 : i32, i32
  }
  func.func @transform_6(%arg0: i32, %arg1: i32) -> (i32, i32) {
    %c0_i32 = arith.constant 0 : i32
    %c0_i32_0 = arith.constant 0 : i32
    %c0_i32_1 = arith.constant 0 : i32
    return %c0_i32, %c0_i32_0 : i32, i32
  }
  func.func @transform_7(%arg0: i32, %arg1: i32) -> (i32, i32) {
    %c0_i32 = arith.constant 0 : i32
    %c0_i32_0 = arith.constant 0 : i32
    %c0_i32_1 = arith.constant 0 : i32
    return %c0_i32, %c0_i32_0 : i32, i32
  }
  func.func @transform_8(%arg0: i32, %arg1: i32) -> (i32, i32) {
    %c0_i32 = arith.constant 0 : i32
    %c0_i32_0 = arith.constant 0 : i32
    %c0_i32_1 = arith.constant 0 : i32
    return %c0_i32, %c0_i32_0 : i32, i32
  }
  func.func @transform_9(%arg0: i32, %arg1: i32) -> (i32, i32, i32, i32) {
    %c0_i32 = arith.constant 0 : i32
    %c0_i32_0 = arith.constant 0 : i32
    %c0_i32_1 = arith.constant 0 : i32
    return %arg0, %c0_i32, %arg1, %c0_i32_0 : i32, i32, i32, i32
  }
}

module attributes {stable_mosaic.version = 11 : i64} {
  func.func @_gpfca_scale_kernel(%arg0: i32, %arg1: i32, %arg2: memref<1x16x4x128xbf16, #tpu.memory_space<vmem>>, %arg3: memref<1x128xf32, #tpu.memory_space<vmem>>, %arg4: memref<1x128xf32, #tpu.memory_space<vmem>>, %arg5: memref<1x128xf32, #tpu.memory_space<vmem>>, %arg6: memref<128x512xbf16, #tpu.memory_space<vmem>>, %arg7: memref<256x128xbf16, #tpu.memory_space<vmem>>, %arg8: memref<128x32xbf16, #tpu.memory_space<vmem>>, %arg9: memref<32x128xbf16, #tpu.memory_space<vmem>>, %arg10: memref<1x128xf32, #tpu.memory_space<vmem>>, %arg11: memref<1x16x4x128xf32, #tpu.memory_space<vmem>>) attributes {dimension_semantics = [#tpu.dimension_semantics<parallel>, #tpu.dimension_semantics<parallel>], iteration_bounds = array<i64: 2, 1>, scalar_prefetch = 0 : i64, scratch_operands = 0 : i64, tpu.core_type = #tpu.core_type<tc>, window_params = [{transform_indices = @transform_0, window_bounds = array<i64: 1, 16, 4, 128>}, {pipeline_mode = #tpu.pipeline_mode<synchronous>, transform_indices = @transform_1, window_bounds = array<i64: 1, 128>}, {pipeline_mode = #tpu.pipeline_mode<synchronous>, transform_indices = @transform_2, window_bounds = array<i64: 1, 128>}, {pipeline_mode = #tpu.pipeline_mode<synchronous>, transform_indices = @transform_3, window_bounds = array<i64: 1, 128>}, {pipeline_mode = #tpu.pipeline_mode<synchronous>, transform_indices = @transform_4, window_bounds = array<i64: 128, 512>}, {pipeline_mode = #tpu.pipeline_mode<synchronous>, transform_indices = @transform_5, window_bounds = array<i64: 256, 128>}, {pipeline_mode = #tpu.pipeline_mode<synchronous>, transform_indices = @transform_6, window_bounds = array<i64: 128, 32>}, {pipeline_mode = #tpu.pipeline_mode<synchronous>, transform_indices = @transform_7, window_bounds = array<i64: 32, 128>}, {pipeline_mode = #tpu.pipeline_mode<synchronous>, transform_indices = @transform_8, window_bounds = array<i64: 1, 128>}, {transform_indices = @transform_9, window_bounds = array<i64: 1, 16, 4, 128>}]} {
    %c0 = arith.constant 0 : index
    %c0_0 = arith.constant 0 : index
    %c0_1 = arith.constant 0 : index
    %c0_2 = arith.constant 0 : index
    %0 = vector.load %arg2[%c0, %c0_0, %c0_1, %c0_2] : memref<1x16x4x128xbf16, #tpu.memory_space<vmem>>, vector<1x16x4x128xbf16>
    %1 = vector.shape_cast %0 : vector<1x16x4x128xbf16> to vector<16x4x128xbf16>
    %2 = arith.extf %1 : vector<16x4x128xbf16> to vector<16x4x128xf32>
    %c0_3 = arith.constant 0 : index
    %c0_4 = arith.constant 0 : index
    %3 = vector.load %arg3[%c0_3, %c0_4] : memref<1x128xf32, #tpu.memory_space<vmem>>, vector<1x128xf32>
    %4 = vector.shape_cast %3 : vector<1x128xf32> to vector<1x1x128xf32>
    %5 = vector.broadcast %4 : vector<1x1x128xf32> to vector<16x4x128xf32>
    %6 = arith.mulf %5, %2 : vector<16x4x128xf32>
    %7 = math.tanh %6 : vector<16x4x128xf32>
    %c0_5 = arith.constant 0 : index
    %c0_6 = arith.constant 0 : index
    %8 = vector.load %arg4[%c0_5, %c0_6] : memref<1x128xf32, #tpu.memory_space<vmem>>, vector<1x128xf32>
    %9 = vector.shape_cast %8 : vector<1x128xf32> to vector<1x1x128xf32>
    %10 = vector.broadcast %9 : vector<1x1x128xf32> to vector<16x4x128xf32>
    %11 = arith.mulf %7, %10 : vector<16x4x128xf32>
    %c0_7 = arith.constant 0 : index
    %c0_8 = arith.constant 0 : index
    %12 = vector.load %arg5[%c0_7, %c0_8] : memref<1x128xf32, #tpu.memory_space<vmem>>, vector<1x128xf32>
    %13 = vector.shape_cast %12 : vector<1x128xf32> to vector<1x1x128xf32>
    %14 = vector.broadcast %13 : vector<1x1x128xf32> to vector<16x4x128xf32>
    %15 = arith.addf %11, %14 : vector<16x4x128xf32>
    %16 = vector.shape_cast %15 : vector<16x4x128xf32> to vector<64x128xf32>
    %17 = arith.truncf %16 : vector<64x128xf32> to vector<64x128xbf16>
    %c0_9 = arith.constant 0 : index
    %c0_10 = arith.constant 0 : index
    %18 = vector.load %arg6[%c0_9, %c0_10] : memref<128x512xbf16, #tpu.memory_space<vmem>>, vector<128x512xbf16>
    %cst = arith.constant dense<0.000000e+00> : vector<64x512xf32>
    %19 = tpu.matmul %17, %18, %cst {dimension_numbers = #tpu.dot_dimension_numbers<[1], [0], [0], [1], [0, 0, 1, 1], [], []>} : vector<64x128xbf16>, vector<128x512xbf16>, vector<64x512xf32> -> vector<64x512xf32>
    %20 = vector.extract_strided_slice %19 {offsets = [0, 0], sizes = [64, 256], strides = [1, 1]} : vector<64x512xf32> to vector<64x256xf32>
    %21 = vector.extract_strided_slice %19 {offsets = [0, 256], sizes = [64, 256], strides = [1, 1]} : vector<64x512xf32> to vector<64x256xf32>
    %22 = arith.negf %20 : vector<64x256xf32>
    %23 = math.exp %22 : vector<64x256xf32>
    %cst_11 = arith.constant 1.000000e+00 : f32
    %24 = vector.broadcast %cst_11 : f32 to vector<64x256xf32>
    %25 = arith.addf %24, %23 : vector<64x256xf32>
    %26 = arith.divf %24, %25 : vector<64x256xf32>
    %27 = arith.mulf %20, %26 : vector<64x256xf32>
    %28 = arith.mulf %21, %27 : vector<64x256xf32>
    %29 = arith.truncf %28 : vector<64x256xf32> to vector<64x256xbf16>
    %c0_12 = arith.constant 0 : index
    %c0_13 = arith.constant 0 : index
    %30 = vector.load %arg7[%c0_12, %c0_13] : memref<256x128xbf16, #tpu.memory_space<vmem>>, vector<256x128xbf16>
    %cst_14 = arith.constant dense<0.000000e+00> : vector<64x128xf32>
    %31 = tpu.matmul %29, %30, %cst_14 {dimension_numbers = #tpu.dot_dimension_numbers<[1], [0], [0], [1], [0, 0, 1, 1], [], []>} : vector<64x256xbf16>, vector<256x128xbf16>, vector<64x128xf32> -> vector<64x128xf32>
    %32 = vector.shape_cast %31 : vector<64x128xf32> to vector<16x4x128xf32>
    %cst_15 = arith.constant dense<0.000000e+00> : vector<16x128xf32>
    %33 = vector.multi_reduction <add>, %32, %cst_15 [1] : vector<16x4x128xf32> to vector<16x128xf32>
    %cst_16 = arith.constant 4.000000e+00 : f32
    %34 = vector.broadcast %cst_16 : f32 to vector<16x128xf32>
    %35 = arith.divf %33, %34 : vector<16x128xf32>
    %36 = arith.truncf %35 : vector<16x128xf32> to vector<16x128xbf16>
    %c0_17 = arith.constant 0 : index
    %c0_18 = arith.constant 0 : index
    %37 = vector.load %arg8[%c0_17, %c0_18] : memref<128x32xbf16, #tpu.memory_space<vmem>>, vector<128x32xbf16>
    %cst_19 = arith.constant dense<0.000000e+00> : vector<16x32xf32>
    %38 = tpu.matmul %36, %37, %cst_19 {dimension_numbers = #tpu.dot_dimension_numbers<[1], [0], [0], [1], [0, 0, 1, 1], [], []>} : vector<16x128xbf16>, vector<128x32xbf16>, vector<16x32xf32> -> vector<16x32xf32>
    %cst_20 = arith.constant 0.000000e+00 : f32
    %39 = vector.broadcast %cst_20 : f32 to vector<16x32xf32>
    %40 = arith.maximumf %38, %39 : vector<16x32xf32>
    %41 = arith.truncf %40 : vector<16x32xf32> to vector<16x32xbf16>
    %c0_21 = arith.constant 0 : index
    %c0_22 = arith.constant 0 : index
    %42 = vector.load %arg9[%c0_21, %c0_22] : memref<32x128xbf16, #tpu.memory_space<vmem>>, vector<32x128xbf16>
    %cst_23 = arith.constant dense<0.000000e+00> : vector<16x128xf32>
    %43 = tpu.matmul %41, %42, %cst_23 {dimension_numbers = #tpu.dot_dimension_numbers<[1], [0], [0], [1], [0, 0, 1, 1], [], []>} : vector<16x32xbf16>, vector<32x128xbf16>, vector<16x128xf32> -> vector<16x128xf32>
    %44 = arith.negf %43 : vector<16x128xf32>
    %45 = math.exp %44 : vector<16x128xf32>
    %cst_24 = arith.constant 1.000000e+00 : f32
    %46 = vector.broadcast %cst_24 : f32 to vector<16x128xf32>
    %47 = arith.addf %46, %45 : vector<16x128xf32>
    %48 = arith.divf %46, %47 : vector<16x128xf32>
    %49 = vector.shape_cast %48 : vector<16x128xf32> to vector<16x1x128xf32>
    %50 = vector.broadcast %49 : vector<16x1x128xf32> to vector<16x4x128xf32>
    %51 = arith.mulf %32, %50 : vector<16x4x128xf32>
    %c0_25 = arith.constant 0 : index
    %c0_26 = arith.constant 0 : index
    %52 = vector.load %arg10[%c0_25, %c0_26] : memref<1x128xf32, #tpu.memory_space<vmem>>, vector<1x128xf32>
    %53 = vector.shape_cast %52 : vector<1x128xf32> to vector<1x1x128xf32>
    %54 = vector.broadcast %53 : vector<1x1x128xf32> to vector<16x4x128xf32>
    %55 = arith.mulf %2, %54 : vector<16x4x128xf32>
    %56 = arith.addf %51, %55 : vector<16x4x128xf32>
    %c0_27 = arith.constant 0 : index
    %c0_28 = arith.constant 0 : index
    %c0_29 = arith.constant 0 : index
    %c0_30 = arith.constant 0 : index
    %57 = vector.load %arg11[%c0_27, %c0_28, %c0_29, %c0_30] : memref<1x16x4x128xf32, #tpu.memory_space<vmem>>, vector<1x16x4x128xf32>
    %58 = vector.shape_cast %57 : vector<1x16x4x128xf32> to vector<16x4x128xf32>
    %59 = vector.shape_cast %56 : vector<16x4x128xf32> to vector<1x16x4x128xf32>
    tpu.vector_store %arg11[%c0_27, %c0_28, %c0_29, %c0_30], %59 {strides = array<i32>} : memref<1x16x4x128xf32, #tpu.memory_space<vmem>>, vector<1x16x4x128xf32>,
    return
  }
  func.func @transform_0(%arg0: i32, %arg1: i32) -> (i32, i32, i32, i32) {
    %c0_i32 = arith.constant 0 : i32
    %c0_i32_0 = arith.constant 0 : i32
    %c0_i32_1 = arith.constant 0 : i32
    return %arg0, %arg1, %c0_i32, %c0_i32_0 : i32, i32, i32, i32
  }
  func.func @transform_1(%arg0: i32, %arg1: i32) -> (i32, i32) {
    %c0_i32 = arith.constant 0 : i32
    %c0_i32_0 = arith.constant 0 : i32
    %c0_i32_1 = arith.constant 0 : i32
    return %c0_i32, %c0_i32_0 : i32, i32
  }
  func.func @transform_2(%arg0: i32, %arg1: i32) -> (i32, i32) {
    %c0_i32 = arith.constant 0 : i32
    %c0_i32_0 = arith.constant 0 : i32
    %c0_i32_1 = arith.constant 0 : i32
    return %c0_i32, %c0_i32_0 : i32, i32
  }
  func.func @transform_3(%arg0: i32, %arg1: i32) -> (i32, i32) {
    %c0_i32 = arith.constant 0 : i32
    %c0_i32_0 = arith.constant 0 : i32
    %c0_i32_1 = arith.constant 0 : i32
    return %c0_i32, %c0_i32_0 : i32, i32
  }
  func.func @transform_4(%arg0: i32, %arg1: i32) -> (i32, i32) {
    %c0_i32 = arith.constant 0 : i32
    %c0_i32_0 = arith.constant 0 : i32
    %c0_i32_1 = arith.constant 0 : i32
    return %c0_i32, %c0_i32_0 : i32, i32
  }
  func.func @transform_5(%arg0: i32, %arg1: i32) -> (i32, i32) {
    %c0_i32 = arith.constant 0 : i32
    %c0_i32_0 = arith.constant 0 : i32
    %c0_i32_1 = arith.constant 0 : i32
    return %c0_i32, %c0_i32_0 : i32, i32
  }
  func.func @transform_6(%arg0: i32, %arg1: i32) -> (i32, i32) {
    %c0_i32 = arith.constant 0 : i32
    %c0_i32_0 = arith.constant 0 : i32
    %c0_i32_1 = arith.constant 0 : i32
    return %c0_i32, %c0_i32_0 : i32, i32
  }
  func.func @transform_7(%arg0: i32, %arg1: i32) -> (i32, i32) {
    %c0_i32 = arith.constant 0 : i32
    %c0_i32_0 = arith.constant 0 : i32
    %c0_i32_1 = arith.constant 0 : i32
    return %c0_i32, %c0_i32_0 : i32, i32
  }
  func.func @transform_8(%arg0: i32, %arg1: i32) -> (i32, i32) {
    %c0_i32 = arith.constant 0 : i32
    %c0_i32_0 = arith.constant 0 : i32
    %c0_i32_1 = arith.constant 0 : i32
    return %c0_i32, %c0_i32_0 : i32, i32
  }
  func.func @transform_9(%arg0: i32, %arg1: i32) -> (i32, i32, i32, i32) {
    %c0_i32 = arith.constant 0 : i32
    %c0_i32_0 = arith.constant 0 : i32
    %c0_i32_1 = arith.constant 0 : i32
    return %arg0, %arg1, %c0_i32, %c0_i32_0 : i32, i32, i32, i32
  }
}

</mosaic_0001>

<bundles_post_ra>
// kernel: tile.51
= control target key start
LH: loop header
LB: loop body
LE: loop exit
PB: predicated region body
PF: predicated region fallthrough
CT: control target
= control target key end

     0   :  { %s22_s0 = inlined_call_operand.vmem [shape: f32[32], index: 0, kind: input, shape index: {}]   ;;  %s23_s1 = inlined_call_operand.vmem [shape: f32[4,32], index: 1, kind: output, shape index: {}]  }
   0x1   :  { %v4_v0 = vld [vmem:[%s22_s0] ss:$0 sm:$0xff] }
   0x2   :  { %5 = vst [vmem:[%s23_s1] sm:$0xf] %v4_v0 }

// kernel: tile.52
= control target key start
LH: loop header
LB: loop body
LE: loop exit
PB: predicated region body
PF: predicated region fallthrough
CT: control target
= control target key end

     0   :  { %vm8_vm0 = vcmask 261120   ;;  %s40_s8 = smov 32   ;;  %s41_s9 = smov 64   ;;  %vm14_vm1 = vcmask 1048320   ;;  %vm20_vm2 = vcmask 785920   ;;  %vm26_vm3 = vcmask 523520   ;;  %s58_s0 = inlined_call_operand.vmem [shape: f32[4,32], index: 0, kind: input, shape index: {}]   ;;  %s59_s1 = inlined_call_operand.vmem [shape: f32[1,128], index: 1, kind: output, shape index: {}]  }
   0x1   :  { %v5_v0 = vld [vmem:[%s58_s0] sm:$0xf]  ;;  %s39_s0 = smov 96  }
   0x2   :  { %6 = vst [vmem:[#allocation1] sm:$0xf] %v5_v0 }
   0x9   :  { %v11_v1 = vld [vmem:[#allocation1 + $0x3] sm:$0x1]   ;;  %v23_v2 = vld [vmem:[#allocation1 + $0x1] sm:$0x1]   ;;  %v7_v3 = vld [vmem:[#allocation1] sm:$0x1]  }
   0xa   :  { %12 = vrot.lane.b32.xlu0 %v11_v1, %s39_s0  ;;  %24 = vrot.lane.b32.xlu1 %v23_v2, %s40_s8  ;;  %v17_v4 = vld [vmem:[#allocation1 + $0x2] sm:$0x1]   ;;  %9 = vst.msk [vmem:[#allocation0] sm:$0x1] %vm8_vm0, %v7_v3  }
   0xe   :  { %18 = vrot.lane.b32.xlu0 %v17_v4, %s41_s9 }
  0x7c   :  { %v13_v5 = vpop.permute.xlu0 %12   ;;  %v25_v6 = vpop.permute.xlu1 %24  }
  0x7d   :  { %15 = vst.msk [vmem:[#allocation0] sm:$0x1] %vm14_vm1, %v13_v5  }
  0x80   :  { %v19_v7 = vpop.permute.xlu0 %18  }
  0x81   :  { %21 = vst.msk [vmem:[#allocation0] sm:$0x1] %vm20_vm2, %v19_v7  }
  0x82   :  { %27 = vst.msk [vmem:[#allocation0] sm:$0x1] %vm26_vm3, %v25_v6  }
  0x89   :  { %v32_v8 = vld [vmem:[#allocation0] sm:$0x1] }
  0x8a   :  { %35 = vst [vmem:[%s59_s1] sm:$0x1] %v32_v8 }

// kernel: ts_block_forward.3
= control target key start
LH: loop header
LB: loop body
LE: loop exit
PB: predicated region body
PF: predicated region fallthrough
CT: control target
= control target key end

     0   :  { %s2395_s30 = smov 0   ;;  %s2397_s10 = smov 0   ;;  %s3112_s0 = inlined_call_operand.vmem [shape: bf16[2,16,4,128], index: 0, kind: input, shape index: {}]   ;;  %s3113_s1 = inlined_call_operand.vmem [shape: f32[1,128], index: 1, kind: input, shape index: {}]   ;;  %s3114_s2 = inlined_call_operand.vmem [shape: f32[1,128], index: 2, kind: input, shape index: {}]   ;;  %s3115_s3 = inlined_call_operand.vmem [shape: f32[1,128], index: 3, kind: input, shape index: {}]   ;;  %s3116_s4 = inlined_call_operand.vmem [shape: bf16[128,512], index: 4, kind: input, shape index: {}]   ;;  %s3117_s5 = inlined_call_operand.vmem [shape: bf16[256,128], index: 5, kind: input, shape index: {}]   ;;  %s3118_s6 = inlined_call_operand.vmem [shape: bf16[128,32], index: 6, kind: input, shape index: {}]   ;;  %s3119_s7 = inlined_call_operand.vmem [shape: bf16[32,128], index: 7, kind: input, shape index: {}]   ;;  %s3120_s8 = inlined_call_operand.vmem [shape: f32[1,128], index: 8, kind: input, shape index: {}]   ;;  %s3121_s9 = inlined_call_operand.vmem [shape: f32[2,16,4,128], index: 9, kind: output, shape index: {}]  }
   0x1   :  { %s2399_s11 = smov 0  }
   0x2 LB: > { %s31_s12 = sadd.s32 1, %s2335_s10  ;;  %p1941_p0 = scmp.ge.s32.totalorder %s2339_s11, 1  ;;  %s2339_s11 = sphi %s2399_s11, %s19_s11   ;;  %s2335_s10 = sphi %s2397_s10, %s3174_s10   ;;  %s2331_s30 = sphi %s2395_s30, %s3173_s30  }
   0x3   : > { %p33_p1 = scmp.ge.s32.totalorder %s31_s12, 2  ;;  %p308_p2 = scmp.lt.s32.totalorder %s2339_s11, 3 }
   0x5   : > { %s3176_s12 = smov (%p33_p1, %s31_s12), 0  ;;  %p309_p3 = pnand %p1941_p0, %p308_p2 }
   0x7   : > { %312 = sbr.rel (%p309_p3) target bundleno = 992 (0x3e0), region = 56 }
   0xc   : > { %v2139_v0 = vld [vmem:[%s3116_s4 + $0xe4] ss:$16 sps:$4 sm:$0xff]   ;;  %p353_p4 = scmp.lt.s32.totalorder %s2331_s30, 1  ;;  %v2141_v1 = vld [vmem:[%s3116_s4 + $0xe0] ss:$16 sps:$4 sm:$0xff]   ;;  %v2341_v2 = vmov 0  }
   0xd   : > { %750 = vmatprep.mubr.bf16.mxu0 %v2341_v2  ;;  %823 = vmatprep.mubr.bf16.mxu1 %v2341_v2  ;;  %v2142_v3 = vld [vmem:[%s3116_s4 + $0xc4] ss:$16 sps:$4 sm:$0xff]   ;;  %v2144_v4 = vld [vmem:[%s3116_s4 + $0xc0] ss:$16 sps:$4 sm:$0xff]   ;;  %v2162_v10 = vld [vmem:[%s3116_s4 + $0xec] ss:$16 sps:$4 sm:$0xff]  }
   0xe   : > { %718 = vmatprep.subr.bf16.mxu0 %v2139_v0  ;;  %s3178_s30 = smov (!%p353_p4, %s2331_s30), 1  ;;  %v2145_v5 = vld [vmem:[%s3116_s4 + $0xa4] ss:$16 sps:$4 sm:$0xff]   ;;  %v2147_v6 = vld [vmem:[%s3116_s4 + $0xa0] ss:$16 sps:$4 sm:$0xff]   ;;  %791 = vmatprep.subr.bf16.mxu1 %v2162_v10  ;;  %vm2343_vm0 = vmmov 0  }
   0xf   : > { %719 = vmatpush1.bf16.msra.mxu0 %v2141_v1  ;;  %s2029_s23 = sshll.u32 %s3178_s30, 5  ;;  %v2148_v7 = vld [vmem:[%s3116_s4 + $0x84] ss:$16 sps:$4 sm:$0xff]   ;;  %v2150_v8 = vld [vmem:[%s3116_s4 + $0x80] ss:$16 sps:$4 sm:$0xff]   ;;  %vm1217_vm1 = vcmask 1043456  }
  0x10   : > { %720 = vmatprep.subr.bf16.mxu0 %v2142_v3  ;;  %s2442_s13 = scalar_lea.vmem %s3112_s0, %s2029_s23  ;;  %v2151_v9 = vld [vmem:[%s3116_s4 + $0x64] ss:$16 sps:$4 sm:$0xff]   ;;  %v2165_v11 = vld [vmem:[%s3116_s4 + $0xe8] ss:$16 sps:$4 sm:$0xff]   ;;  %v2474_v19 = vld [vmem:[%s3113_s1] ss:$0 sm:$0xff] }
  0x11   : > { %v2457_v12 = vld [vmem:[%s2442_s13] sm:$0x3]  ;;  %v2460_v13 = vld [vmem:[%s2442_s13 + $0x2] sm:$0x3]  ;;  %v2463_v14 = vld [vmem:[%s2442_s13 + $0x4] sm:$0x3]  ;;  %792 = vmatpush1.bf16.msra.mxu1 %v2165_v11 }
  0x12   : > { %v2466_v15 = vld [vmem:[%s2442_s13 + $0x6] sm:$0x3]  ;;  %v3137_v16 = vunpack.c.l.bf16 %v2457_v12  ;;  %v3136_v17 = vunpack.c.l.bf16 %v2460_v13  ;;  %v3135_v18 = vunpack.c.l.bf16 %v2463_v14  ;;  %v2153_v20 = vld [vmem:[%s3116_s4 + $0x60] ss:$16 sps:$4 sm:$0xff]   ;;  %v2166_v26 = vld [vmem:[%s3116_s4 + $0xcc] ss:$16 sps:$4 sm:$0xff]  }
  0x13   : > { %721 = vmatpush1.bf16.msra.mxu0 %v2144_v4  ;;  %v2154_v21 = vld [vmem:[%s3116_s4 + $0x44] ss:$16 sps:$4 sm:$0xff]   ;;  %v3134_v22 = vunpack.c.l.bf16 %v2466_v15  ;;  %v2168_v27 = vld [vmem:[%s3116_s4 + $0xc8] ss:$16 sps:$4 sm:$0xff]   ;;  %v2169_v29 = vld [vmem:[%s3116_s4 + $0xac] ss:$16 sps:$4 sm:$0xff]   ;;  %793 = vmatprep.subr.bf16.mxu1 %v2166_v26 }
  0x14   : > { %722 = vmatprep.subr.bf16.mxu0 %v2145_v5  ;;  %v412_v23 = vmul.f32 %v2474_v19, %v3137_v16  ;;  %v413_v24 = vmul.f32 %v2474_v19, %v3136_v17  ;;  %v414_v25 = vmul.f32 %v2474_v19, %v3135_v18  ;;  %v2171_v30 = vld [vmem:[%s3116_s4 + $0xa8] ss:$16 sps:$4 sm:$0xff]   ;;  %v2514_v33 = vld [vmem:[%s2442_s13 + $0xc] sm:$0x3]  ;;  %v2517_v34 = vld [vmem:[%s2442_s13 + $0xe] sm:$0x3] }
  0x15   : > { %v415_v28 = vmul.f32 %v2474_v19, %v3134_v22  ;;  %v2508_v31 = vld [vmem:[%s2442_s13 + $0x8] sm:$0x3]  ;;  %v2511_v32 = vld [vmem:[%s2442_s13 + $0xa] sm:$0x3]  ;;  %794 = vmatpush1.bf16.msra.mxu1 %v2168_v27  ;;  %v2156_v37 = vld [vmem:[%s3116_s4 + $0x40] ss:$16 sps:$4 sm:$0xff]   ;;  %v3131_v38 = vunpack.c.l.bf16 %v2514_v33  ;;  %v3130_v39 = vunpack.c.l.bf16 %v2517_v34 }
  0x16   : > { %2213 = vtanh.f32 %v412_v23  ;;  %v3133_v35 = vunpack.c.l.bf16 %v2508_v31  ;;  %v3132_v36 = vunpack.c.l.bf16 %v2511_v32  ;;  %795 = vmatprep.subr.bf16.mxu1 %v2169_v29  ;;  %v2172_v40 = vld [vmem:[%s3116_s4 + $0x8c] ss:$16 sps:$4 sm:$0xff]   ;;  %v2157_v41 = vld [vmem:[%s3116_s4 + $0x24] ss:$16 sps:$4 sm:$0xff]   ;;  %v2174_v46 = vld [vmem:[%s3116_s4 + $0x88] ss:$16 sps:$4 sm:$0xff]  }
  0x17   : > { %723 = vmatpush1.bf16.msra.mxu0 %v2147_v6  ;;  %2215 = vtanh.f32 %v413_v24  ;;  %v418_v44 = vmul.f32 %v2474_v19, %v3131_v38  ;;  %v419_v45 = vmul.f32 %v2474_v19, %v3130_v39  ;;  %v2548_v47 = vld [vmem:[%s2442_s13 + $0x10] sm:$0x3]  ;;  %v2551_v48 = vld [vmem:[%s2442_s13 + $0x12] sm:$0x3]  ;;  %v2554_v49 = vld [vmem:[%s2442_s13 + $0x14] sm:$0x3] }
  0x18   : > { %724 = vmatprep.subr.bf16.mxu0 %v2148_v7  ;;  %2217 = vtanh.f32 %v414_v25  ;;  %v416_v42 = vmul.f32 %v2474_v19, %v3133_v35  ;;  %v417_v43 = vmul.f32 %v2474_v19, %v3132_v36  ;;  %v2557_v50 = vld [vmem:[%s2442_s13 + $0x16] sm:$0x3]  ;;  %v3129_v51 = vunpack.c.l.bf16 %v2548_v47  ;;  %v2159_v53 = vld [vmem:[%s3116_s4 + $0x20] ss:$16 sps:$4 sm:$0xff]   ;;  %v2175_v54 = vld [vmem:[%s3116_s4 + $0x6c] ss:$16 sps:$4 sm:$0xff]  }
  0x19   : > { %2219 = vtanh.f32 %v415_v28  ;;  %796 = vmatpush1.bf16.msra.mxu1 %v2171_v30  ;;  %v3128_v52 = vunpack.c.l.bf16 %v2551_v48  ;;  %v3127_v55 = vunpack.c.l.bf16 %v2554_v49  ;;  %v3126_v56 = vunpack.c.l.bf16 %v2557_v50  ;;  %v2160_v57 = vld [vmem:[%s3116_s4 + $0x4] ss:$16 sps:$4 sm:$0xff]   ;;  %v2164_v60 = vld [vmem:[%s3116_s4] ss:$16 sps:$4 sm:$0xff]   ;;  %v2177_v61 = vld [vmem:[%s3116_s4 + $0x68] ss:$16 sps:$4 sm:$0xff]  }
  0x1a   : > { %2221 = vtanh.f32 %v416_v42  ;;  %797 = vmatprep.subr.bf16.mxu1 %v2172_v40  ;;  %v420_v58 = vmul.f32 %v2474_v19, %v3129_v51  ;;  %v2591_v0 = vld [vmem:[%s2442_s13 + $0x18] sm:$0x3]  ;;  %v2594_v1 = vld [vmem:[%s2442_s13 + $0x1a] sm:$0x3]  ;;  %v2597_v3 = vld [vmem:[%s2442_s13 + $0x1c] sm:$0x3] }
  0x1b   : > { %725 = vmatpush1.bf16.msra.mxu0 %v2150_v8  ;;  %2223 = vtanh.f32 %v417_v43  ;;  %v421_v59 = vmul.f32 %v2474_v19, %v3128_v52  ;;  %v422_v62 = vmul.f32 %v2474_v19, %v3127_v55  ;;  %v423_v63 = vmul.f32 %v2474_v19, %v3126_v56  ;;  %v2600_v4 = vld [vmem:[%s2442_s13 + $0x1e] sm:$0x3]  ;;  %v2606_v6 = vld [vmem:[%s3114_s2] ss:$0 sm:$0xff]  ;;  %v2183_v40 = vld [vmem:[%s3116_s4 + $0x28] ss:$16 sps:$4 sm:$0xff]  }
  0x1c   : > { %726 = vmatprep.subr.bf16.mxu0 %v2151_v9  ;;  %2225 = vtanh.f32 %v418_v44  ;;  %v3125_v5 = vunpack.c.l.bf16 %v2591_v0  ;;  %v2178_v7 = vld [vmem:[%s3116_s4 + $0x4c] ss:$16 sps:$4 sm:$0xff]   ;;  %v3124_v8 = vunpack.c.l.bf16 %v2594_v1  ;;  %v3123_v9 = vunpack.c.l.bf16 %v2597_v3  ;;  %v2617_v11 = vld [vmem:[%s3115_s3] ss:$0 sm:$0xff]  ;;  %s2030_s24 = sshll.u32 %s3178_s30, 6 }
  0x1d   : > { %2227 = vtanh.f32 %v419_v45  ;;  %798 = vmatpush1.bf16.msra.mxu1 %v2174_v46  ;;  %v3122_v10 = vunpack.c.l.bf16 %v2600_v4  ;;  %v2181_v23 = vld [vmem:[%s3116_s4 + $0x2c] ss:$16 sps:$4 sm:$0xff]   ;;  %vm1411_vm2 = vcmask 1041409   ;;  %vm1413_vm3 = vcmask 1042434   ;;  %s3038_s13 = scalar_lea.vmem %s3121_s9, %s2030_s24 }
  0x1e   : > { %2229 = vtanh.f32 %v420_v58  ;;  %799 = vmatprep.subr.bf16.mxu1 %v2175_v54  ;;  %v425_v24 = vmul.f32 %v2474_v19, %v3124_v8  ;;  %v426_v25 = vmul.f32 %v2474_v19, %v3123_v9  ;;  %vm1415_vm4 = vcmask 1043459  }
  0x1f   : > { %727 = vmatpush1.bf16.msra.mxu0 %v2153_v20  ;;  %2231 = vtanh.f32 %v421_v59  ;;  %v2180_v20 = vld [vmem:[%s3116_s4 + $0x48] ss:$16 sps:$4 sm:$0xff]   ;;  %v427_v27 = vmul.f32 %v2474_v19, %v3122_v10  ;;  %vm1417_vm5 = vcmask 1044484   ;;  %vm1419_vm6 = vcmask 1045509  }
  0x20   : > { %728 = vmatprep.subr.bf16.mxu0 %v2154_v21  ;;  %2233 = vtanh.f32 %v422_v62  ;;  %v424_v21 = vmul.f32 %v2474_v19, %v3125_v5  ;;  %v2184_v19 = vld [vmem:[%s3116_s4 + $0xc] ss:$16 sps:$4 sm:$0xff]   ;;  %vm1421_vm7 = vcmask 1046534   ;;  %vm1423_vm8 = vcmask 1047559  }
  0x21   : > { %2235 = vtanh.f32 %v423_v63  ;;  %800 = vmatpush1.bf16.msra.mxu1 %v2177_v61  ;;  %vm1542_vm9 = vcmask 261120  }
  0x22   : > { %801 = vmatprep.subr.bf16.mxu1 %v2178_v7  ;;  %2237 = vtanh.f32 %v424_v21 }
  0x23   : > { %729 = vmatpush1.bf16.msra.mxu0 %v2156_v37  ;;  %v2214_v26 = vpop.eup %2213  ;;  %2239 = vtanh.f32 %v425_v24 }
  0x24   : > { %730 = vmatprep.subr.bf16.mxu0 %v2157_v41  ;;  %v2216_v28 = vpop.eup %2215  ;;  %v451_v29 = vmul.f32 %v2214_v26, %v2606_v6  ;;  %2241 = vtanh.f32 %v426_v25 }
  0x25   : > { %v2218_v30 = vpop.eup %2217  ;;  %v452_v37 = vmul.f32 %v2216_v28, %v2606_v6  ;;  %802 = vmatpush1.bf16.msra.mxu1 %v2180_v20  ;;  %2243 = vtanh.f32 %v427_v27 }
  0x26   : > { %v2220_v41 = vpop.eup %2219  ;;  %v453_v42 = vmul.f32 %v2218_v30, %v2606_v6  ;;  %v474_v43 = vadd.f32 %v2617_v11, %v451_v29  ;;  %803 = vmatprep.subr.bf16.mxu1 %v2181_v23 }
  0x27   : > { %731 = vmatpush1.bf16.msra.mxu0 %v2159_v53  ;;  %v454_v44 = vmul.f32 %v2220_v41, %v2606_v6  ;;  %v475_v45 = vadd.f32 %v2617_v11, %v452_v37  ;;  %v2222_v46 = vpop.eup %2221 }
  0x28   : > { %732 = vmatprep.subr.bf16.mxu0 %v2160_v57  ;;  %v476_v53 = vadd.f32 %v2617_v11, %v453_v42  ;;  %v2224_v54 = vpop.eup %2223  ;;  %v455_v59 = vmul.f32 %v2222_v46, %v2606_v6 }
  0x29   : > { %v477_v57 = vadd.f32 %v2617_v11, %v454_v44  ;;  %v506_v58 = vcombine.low %v474_v43, %v475_v45  ;;  %v2226_v61 = vpop.eup %2225  ;;  %v456_v62 = vmul.f32 %v2224_v54, %v2606_v6  ;;  %804 = vmatpush1.bf16.msra.mxu1 %v2183_v40 }
  0x2a   : > { %v2228_v63 = vpop.eup %2227  ;;  %v457_v20 = vmul.f32 %v2226_v61, %v2606_v6  ;;  %v478_v21 = vadd.f32 %v2617_v11, %v455_v59  ;;  %805 = vmatprep.subr.bf16.mxu1 %v2184_v19 }
  0x2b   : > { %733 = vmatpush1.bf16.msra.mxu0 %v2164_v60  ;;  %v2186_v60 = vld [vmem:[%s3116_s4 + $0x8] ss:$16 sps:$4 sm:$0xff]   ;;  %v507_v7 = vcombine.low %v476_v53, %v477_v57  ;;  %v2230_v23 = vpop.eup %2229  ;;  %v458_v24 = vmul.f32 %v2228_v63, %v2606_v6  ;;  %v479_v25 = vadd.f32 %v2617_v11, %v456_v62 }
  0x2c   : > { %v2232_v26 = vpop.eup %2231  ;;  %v480_v28 = vadd.f32 %v2617_v11, %v457_v20  ;;  %v459_v37 = vmul.f32 %v2230_v23, %v2606_v6 }
  0x2d   : > { %v522_v27 = vpack.c.bf16 %v507_v7, %v506_v58  ;;  %v2234_v29 = vpop.eup %2233  ;;  %v481_v30 = vadd.f32 %v2617_v11, %v458_v24  ;;  %v460_v41 = vmul.f32 %v2232_v26, %v2606_v6  ;;  %v508_v40 = vcombine.low %v478_v21, %v479_v25  ;;  %806 = vmatpush1.bf16.msra.mxu1 %v2186_v60 }
  0x2e   : > { %v2236_v42 = vpop.eup %2235  ;;  %v461_v43 = vmul.f32 %v2234_v29, %v2606_v6  ;;  %v482_v53 = vadd.f32 %v2617_v11, %v459_v37  ;;  %v2187_v37 = vld [vmem:[%s3117_s5 + $0x78] sm:$0xff]  }
  0x2f   : > { %751 = vmatmul.mubr.bf16.vlgmr.msra.gmra.mxu0 %v522_v27  ;;  %v509_v19 = vcombine.low %v480_v28, %v481_v30  ;;  %v462_v44 = vmul.f32 %v2236_v42, %v2606_v6  ;;  %v2238_v45 = vpop.eup %2237  ;;  %v483_v54 = vadd.f32 %v2617_v11, %v460_v41  ;;  %2031 = vmatprep.subr.bf16.mxu0 %v2187_v37  ;;  %v2189_v41 = vld [vmem:[%s3117_s5 + $0x70] sm:$0xff]   ;;  %v2191_v42 = vld [vmem:[%s3117_s5 + $0x68] sm:$0xff]  }
  0x30   : > { %760 = vmatprep.mubr.bf16.mxu0 %v2341_v2  ;;  %v2240_v46 = vpop.eup %2239  ;;  %824 = vmatmul.mubr.bf16.vlgmr.msra.gmra.mxu1 %v522_v27  ;;  %v484_v59 = vadd.f32 %v2617_v11, %v461_v43  ;;  %v463_v63 = vmul.f32 %v2238_v45, %v2606_v6  ;;  %v2193_v43 = vld [vmem:[%s3117_s5 + $0x60] sm:$0xff]   ;;  %v2196_v45 = vld [vmem:[%s3117_s5 + $0x18] sm:$0xff]  }
  0x31   : > { %v2242_v57 = vpop.eup %2241  ;;  %v523_v58 = vpack.c.bf16 %v509_v19, %v508_v40  ;;  %v485_v61 = vadd.f32 %v2617_v11, %v462_v44  ;;  %833 = vmatprep.mubr.bf16.mxu1 %v2341_v2  ;;  %v510_v62 = vcombine.low %v482_v53, %v483_v54  ;;  %v464_v20 = vmul.f32 %v2240_v46, %v2606_v6  ;;  %v2192_v40 = vld [vmem:[%s3117_s5 + $0x28] sm:$0xff]   ;;  %v2194_v19 = vld [vmem:[%s3117_s5 + $0x20] sm:$0xff]   ;;  %v2195_v44 = vld [vmem:[%s3117_s5 + $0x58] sm:$0xff]  }
  0x32   : > { %v2244_v60 = vpop.eup %2243  ;;  %v465_v21 = vmul.f32 %v2242_v57, %v2606_v6  ;;  %v486_v24 = vadd.f32 %v2617_v11, %v463_v63  ;;  %v2197_v46 = vld [vmem:[%s3117_s5 + $0x50] sm:$0xff]   ;;  %v2199_v54 = vld [vmem:[%s3117_s5 + $0x48] sm:$0xff]  }
  0x33   : > { %v511_v7 = vcombine.low %v484_v59, %v485_v61  ;;  %v466_v23 = vmul.f32 %v2244_v60, %v2606_v6  ;;  %v487_v26 = vadd.f32 %v2617_v11, %v464_v20  ;;  %v2198_v53 = vld [vmem:[%s3117_s5 + $0x10] sm:$0xff]   ;;  %v2200_v57 = vld [vmem:[%s3117_s5 + $0x8] sm:$0xff]   ;;  %v2202_v59 = vld [vmem:[%s3117_s5] sm:$0xff]  }
  0x34   : > { %v488_v27 = vadd.f32 %v2617_v11, %v465_v21 }
  0x35   : > { %v524_v25 = vpack.c.bf16 %v511_v7, %v510_v62  ;;  %v489_v28 = vadd.f32 %v2617_v11, %v466_v23  ;;  %v512_v29 = vcombine.low %v486_v24, %v487_v26  ;;  %v2188_v11 = vld [vmem:[%s3117_s5 + $0x38] sm:$0xff]  }
  0x36   : > { %2032 = vmatpush3.bf16.msra.mxu0 %v2188_v11 }
  0x37   : > { %761 = vmatmul.mubr.bf16.gmra.mxu0 %v523_v58  ;;  %v513_v30 = vcombine.low %v488_v27, %v489_v28  ;;  %2033 = vmatprep.subr.bf16.mxu0 %v2189_v41 }
  0x38   : > { %770 = vmatprep.mubr.bf16.mxu0 %v2341_v2  ;;  %834 = vmatmul.mubr.bf16.gmra.mxu1 %v523_v58  ;;  %v2201_v58 = vld [vmem:[%s3117_s5 + $0x40] sm:$0xff]  }
  0x39   : > { %843 = vmatprep.mubr.bf16.mxu1 %v2341_v2  ;;  %v525_v6 = vpack.c.bf16 %v513_v30, %v512_v29 }
  0x3f   : > { %771 = vmatmul.mubr.bf16.gmra.mxu0 %v524_v25 }
  0x40   : > { %780 = vmatprep.mubr.bf16.mxu0 %v2341_v2  ;;  %844 = vmatmul.mubr.bf16.gmra.mxu1 %v524_v25 }
  0x41   : > { %853 = vmatprep.mubr.bf16.mxu1 %v2341_v2  ;;  %v2190_v2 = vld [vmem:[%s3117_s5 + $0x30] sm:$0xff]  }
  0x42   : > { %2034 = vmatpush3.bf16.msra.mxu0 %v2190_v2 }
  0x43   : > { %2035 = vmatprep.subr.bf16.mxu0 %v2191_v42 }
  0x46   : > { %2036 = vmatpush3.bf16.msra.mxu0 %v2192_v40 }
  0x47   : > { %781 = vmatmul.mubr.bf16.gmra.mxu0 %v525_v6  ;;  %2037 = vmatprep.subr.bf16.mxu0 %v2193_v43 }
  0x48   : > { %854 = vmatmul.mubr.bf16.gmra.mxu1 %v525_v6 }
  0x4a   : > { %2038 = vmatpush3.bf16.msra.mxu0 %v2194_v19 }
  0x4b   : > { %2039 = vmatprep.subr.bf16.mxu0 %v2195_v44 }
  0x4e   : > { %2040 = vmatpush3.bf16.msra.mxu0 %v2196_v45 }
  0x4f   : > { %2041 = vmatprep.subr.bf16.mxu0 %v2197_v46 }
  0x52   : > { %2042 = vmatpush3.bf16.msra.mxu0 %v2198_v53 }
  0x53   : > { %2043 = vmatprep.subr.bf16.mxu0 %v2199_v54 }
  0x56   : > { %2044 = vmatpush3.bf16.msra.mxu0 %v2200_v57 }
  0x57   : > { %2045 = vmatprep.subr.bf16.mxu0 %v2201_v58 }
  0x5a   : > { %2046 = vmatpush3.bf16.msra.mxu0 %v2202_v59 }
  0xef   : > { %v2732_v61 = vpop.f32.mrf.mxu0 }
  0xf0   : > { %v1981_v60 = vmul.f32 -1.442695, %v2732_v61  ;;  %v2741_v21 = vpop.f32.mrf.mxu1 }
  0xf1   : > { %v2735_v62 = vpop.f32.mrf.mxu0 }
  0xf2   : > { %2245 = vpow2.f32 %v1981_v60  ;;  %v1982_v63 = vmul.f32 -1.442695, %v2735_v62  ;;  %v2749_v27 = vpop.f32.mrf.mxu1 }
  0xf3   : > { %v2738_v7 = vpop.f32.mrf.mxu0 }
  0xf4   : > { %2247 = vpow2.f32 %v1982_v63  ;;  %v1983_v20 = vmul.f32 -1.442695, %v2738_v7  ;;  %v2757_v37 = vpop.f32.mrf.mxu1 }
  0xf5   : > { %v2743_v23 = vpop.f32.mrf.mxu0 }
  0xf6   : > { %2249 = vpow2.f32 %v1983_v20  ;;  %v1984_v24 = vmul.f32 -1.442695, %v2743_v23  ;;  %v2765_v19 = vpop.f32.mrf.mxu1 }
  0xf7   : > { %v2746_v25 = vpop.f32.mrf.mxu0 }
  0xf8   : > { %2251 = vpow2.f32 %v1984_v24  ;;  %v1985_v26 = vmul.f32 -1.442695, %v2746_v25  ;;  %v2773_v60 = vpop.f32.mrf.mxu1 }
  0xf9   : > { %v2751_v28 = vpop.f32.mrf.mxu0 }
  0xfa   : > { %2253 = vpow2.f32 %v1985_v26  ;;  %v1986_v29 = vmul.f32 -1.442695, %v2751_v28 }
  0xfb   : > { %v2754_v30 = vpop.f32.mrf.mxu0 }
  0xfc   : > { %2255 = vpow2.f32 %v1986_v29  ;;  %v1987_v6 = vmul.f32 -1.442695, %v2754_v30 }
  0xfd   : > { %v2759_v11 = vpop.f32.mrf.mxu0 }
  0xfe   : > { %2257 = vpow2.f32 %v1987_v6  ;;  %v1988_v41 = vmul.f32 -1.442695, %v2759_v11 }
  0xff   : > { %v2246_v2 = vpop.eup %2245  ;;  %v2762_v42 = vpop.f32.mrf.mxu0 }
 0x100   : > { %v912_v40 = vadd.f32 1.0, %v2246_v2  ;;  %2259 = vpow2.f32 %v1988_v41  ;;  %v1989_v43 = vmul.f32 -1.442695, %v2762_v42 }
 0x101   : > { %v2248_v44 = vpop.eup %2247  ;;  %v2767_v45 = vpop.f32.mrf.mxu0 }
 0x102   : > { %2261 = vrcp.f32 %v912_v40  ;;  %v913_v46 = vadd.f32 1.0, %v2248_v44  ;;  %v1990_v53 = vmul.f32 -1.442695, %v2767_v45  ;;  %v2781_v40 = vpop.f32.mrf.mxu1 }
 0x103   : > { %v2250_v54 = vpop.eup %2249  ;;  %2263 = vpow2.f32 %v1989_v43  ;;  %v2770_v57 = vpop.f32.mrf.mxu0 }
 0x104   : > { %2265 = vrcp.f32 %v913_v46  ;;  %v914_v58 = vadd.f32 1.0, %v2250_v54  ;;  %v1991_v59 = vmul.f32 -1.442695, %v2770_v57 }
 0x105   : > { %v2252_v63 = vpop.eup %2251  ;;  %2267 = vpow2.f32 %v1990_v53  ;;  %v2775_v20 = vpop.f32.mrf.mxu0 }
 0x106   : > { %2269 = vrcp.f32 %v914_v58  ;;  %v915_v24 = vadd.f32 1.0, %v2252_v63  ;;  %v1992_v26 = vmul.f32 -1.442695, %v2775_v20 }
 0x107   : > { %v2254_v29 = vpop.eup %2253  ;;  %2271 = vpow2.f32 %v1991_v59  ;;  %v2778_v6 = vpop.f32.mrf.mxu0 }
 0x108   : > { %2273 = vrcp.f32 %v915_v24  ;;  %v916_v41 = vadd.f32 1.0, %v2254_v29  ;;  %v1993_v2 = vmul.f32 -1.442695, %v2778_v6  ;;  %v839_v24 = vpop.f32.mrf.mxu1 }
 0x109   : > { %v2256_v43 = vpop.eup %2255  ;;  %2275 = vpow2.f32 %v1992_v26  ;;  %v2783_v44 = vpop.f32.mrf.mxu0 }
 0x10a   : > { %2277 = vrcp.f32 %v916_v41  ;;  %v917_v46 = vadd.f32 1.0, %v2256_v43  ;;  %v1994_v53 = vmul.f32 -1.442695, %v2783_v44 }
 0x10b   : > { %v2258_v54 = vpop.eup %2257  ;;  %2279 = vpow2.f32 %v1993_v2  ;;  %v2786_v58 = vpop.f32.mrf.mxu0 }
 0x10c   : > { %2281 = vrcp.f32 %v917_v46  ;;  %v918_v59 = vadd.f32 1.0, %v2258_v54  ;;  %v1995_v63 = vmul.f32 -1.442695, %v2786_v58  ;;  %v841_v2 = vpop.f32.mrf.mxu1 }
 0x10d   : > { %v2260_v29 = vpop.eup %2259  ;;  %2283 = vpow2.f32 %v1994_v53  ;;  %v2789_v10 = vpop.f32.mrf.mxu0 }
 0x10e   : > { %2285 = vrcp.f32 %v918_v59  ;;  %v919_v26 = vadd.f32 1.0, %v2260_v29  ;;  %v1996_v41 = vmul.f32 -1.442695, %v2789_v10  ;;  %v2794_v59 = vpop.f32.mrf.mxu1 }
 0x10f   : > { %v2262_v43 = vpop.eup %2261  ;;  %2287 = vpow2.f32 %v1995_v63 }
 0x110   : > { %v2264_v9 = vpop.eup %2263  ;;  %2289 = vrcp.f32 %v919_v26  ;;  %v960_v51 = vmul.f32 %v2262_v43, %v2732_v61 }
 0x111   : > { %v2266_v8 = vpop.eup %2265  ;;  %2291 = vpow2.f32 %v1996_v41  ;;  %v920_v54 = vadd.f32 1.0, %v2264_v9 }
 0x112   : > { %v2268_v46 = vpop.eup %2267  ;;  %v961_v53 = vmul.f32 %v2266_v8, %v2735_v62  ;;  %v847_v62 = vpop.f32.mrf.mxu1 }
 0x113   : > { %v2270_v5 = vpop.eup %2269  ;;  %v921_v56 = vadd.f32 1.0, %v2268_v46 }
 0x114   : > { %v2272_v55 = vpop.eup %2271  ;;  %v962_v52 = vmul.f32 %v2270_v5, %v2738_v7  ;;  %v977_v8 = vmul.f32 %v961_v53, %v2749_v27  ;;  %v849_v27 = vpop.f32.mrf.mxu1 }
 0x115   : > { %v2274_v29 = vpop.eup %2273  ;;  %2293 = vrcp.f32 %v921_v56  ;;  %v922_v63 = vadd.f32 1.0, %v2272_v55  ;;  %v976_v56 = vmul.f32 %v960_v51, %v2741_v21 }
 0x116   : > { %v2276_v26 = vpop.eup %2275  ;;  %v963_v39 = vmul.f32 %v2274_v29, %v2743_v23  ;;  %2295 = vrcp.f32 %v920_v54  ;;  %v978_v46 = vmul.f32 %v962_v52, %v2757_v37 }
 0x117   : > { %v2278_v41 = vpop.eup %2277  ;;  %2297 = vrcp.f32 %v922_v63  ;;  %v923_v9 = vadd.f32 1.0, %v2276_v26 }
 0x118   : > { %v2280_v38 = vpop.eup %2279  ;;  %v979_v5 = vmul.f32 %v963_v39, %v2765_v19  ;;  %v992_v29 = vpack.c.bf16 %v978_v46, %v976_v56  ;;  %v964_v39 = vmul.f32 %v2278_v41, %v2746_v25  ;;  %v851_v46 = vpop.f32.mrf.mxu1 }
 0x119   : > { %v2282_v7 = vpop.eup %2281  ;;  %2299 = vrcp.f32 %v923_v9  ;;  %v924_v61 = vadd.f32 1.0, %v2280_v38 }
 0x11a   : > { %v2284_v55 = vpop.eup %2283  ;;  %v993_v43 = vpack.c.bf16 %v979_v5, %v977_v8  ;;  %v965_v26 = vmul.f32 %v2282_v7, %v2751_v28  ;;  %v855_v56 = vpop.f32.mrf.mxu1 }
 0x11b   : > { %v2286_v23 = vpop.eup %2285  ;;  %v925_v54 = vadd.f32 1.0, %v2284_v55 }
 0x11c   : > { %v2288_v63 = vpop.eup %2287  ;;  %v966_v52 = vmul.f32 %v2286_v23, %v2754_v30  ;;  %1160 = vmatprep.mubr.bf16.mxu0 %v993_v43  ;;  %v981_v9 = vmul.f32 %v965_v26, %v2781_v40  ;;  %v980_v30 = vmul.f32 %v964_v39, %v2773_v60  ;;  %v857_v43 = vpop.f32.mrf.mxu1 }
 0x11d   : > { %v2290_v37 = vpop.eup %2289  ;;  %2301 = vrcp.f32 %v925_v54  ;;  %v926_v19 = vadd.f32 1.0, %v2288_v63  ;;  %1161 = vmatmul.mubr.bf16.vlgmr.msra.gmra.mxu0 %v992_v29 }
 0x11e   : > { %v2292_v51 = vpop.eup %2291  ;;  %v967_v38 = vmul.f32 %v2290_v37, %v2759_v11  ;;  %2303 = vrcp.f32 %v924_v61  ;;  %v982_v53 = vmul.f32 %v966_v52, %v839_v24 }
 0x11f   : > { %2305 = vrcp.f32 %v926_v19  ;;  %v927_v21 = vadd.f32 1.0, %v2292_v51 }
 0x120   : > { %v983_v28 = vmul.f32 %v967_v38, %v841_v2  ;;  %v994_v41 = vpack.c.bf16 %v982_v53, %v980_v30  ;;  %v2209_v30 = vld [vmem:[%s3118_s6 + $0x8] sm:$0xff]  }
 0x121   : > { %2307 = vrcp.f32 %v927_v21 }
 0x122   : > { %v2294_v8 = vpop.eup %2293  ;;  %v995_v5 = vpack.c.bf16 %v983_v28, %v981_v9  ;;  %v2206_v9 = vld [vmem:[%s3118_s6 + $0x20] sm:$0xff]   ;;  %v2207_v28 = vld [vmem:[%s3118_s6 + $0x18] sm:$0xff]  }
 0x123   : > { %v2296_v25 = vpop.eup %2295  ;;  %v969_v11 = vmul.f32 %v2294_v8, %v2767_v45  ;;  %v859_v45 = vpop.f32.mrf.mxu1  ;;  %v2210_v8 = vld [vmem:[%s3118_s6] sm:$0xff]  }
 0x124   : > { %v2298_v7 = vpop.eup %2297  ;;  %1168 = vmatprep.mubr.bf16.mxu0 %v995_v5  ;;  %v968_v40 = vmul.f32 %v2296_v25, %v2762_v42 }
 0x125   : > { %v970_v55 = vmul.f32 %v2298_v7, %v2770_v57  ;;  %1169 = vmatmul.mubr.bf16.gmra.mxu0 %v994_v41  ;;  %v985_v60 = vmul.f32 %v969_v11, %v847_v62  ;;  %v861_v19 = vpop.f32.mrf.mxu1 }
 0x126   : > { %v2300_v24 = vpop.eup %2299  ;;  %v984_v29 = vmul.f32 %v968_v40, %v2794_v59 }
 0x127   : > { %v971_v2 = vmul.f32 %v2300_v24, %v2775_v20  ;;  %v986_v61 = vmul.f32 %v970_v55, %v849_v27 }
 0x129   : > { %v987_v23 = vmul.f32 %v971_v2, %v851_v46  ;;  %v996_v37 = vpack.c.bf16 %v986_v61, %v984_v29  ;;  %v2208_v46 = vld [vmem:[%s3118_s6 + $0x10] sm:$0xff]  }
 0x12a   : > { %v2302_v54 = vpop.eup %2301 }
 0x12b   : > { %v2304_v63 = vpop.eup %2303  ;;  %v997_v26 = vpack.c.bf16 %v987_v23, %v985_v60  ;;  %v973_v57 = vmul.f32 %v2302_v54, %v2783_v44  ;;  %v2203_v44 = vld [vmem:[%s3118_s6 + $0x38] sm:$0xff]  }
 0x12c   : > { %v2306_v52 = vpop.eup %2305  ;;  %v972_v20 = vmul.f32 %v2304_v63, %v2778_v6  ;;  %v2205_v6 = vld [vmem:[%s3118_s6 + $0x28] sm:$0xff]  }
 0x12d   : > { %v974_v39 = vmul.f32 %v2306_v52, %v2786_v58  ;;  %1176 = vmatprep.mubr.bf16.mxu0 %v997_v26  ;;  %v989_v51 = vmul.f32 %v973_v57, %v857_v43  ;;  %v3138_v58 = vmov 0.0  }
 0x12e   : > { %v2308_v42 = vpop.eup %2307  ;;  %1177 = vmatmul.mubr.bf16.gmra.mxu0 %v996_v37  ;;  %v988_v38 = vmul.f32 %v972_v20, %v855_v56  ;;  %2083 = vmatprep.subr.bf16.mxu1 %v3138_v58 }
 0x12f   : > { %v975_v62 = vmul.f32 %v2308_v42, %v2789_v10  ;;  %v990_v27 = vmul.f32 %v974_v39, %v859_v45  ;;  %2084 = vmatpush3.bf16.msra.mxu1 %v2203_v44  ;;  %v2204_v10 = vld [vmem:[%s3118_s6 + $0x30] sm:$0xff]   ;;  %2099 = vmatprep.mubr.msk.bf16.mxu1 %vm2343_vm0, %v3138_v58 }
 0x130   : > { %2085 = vmatprep.subr.bf16.mxu1 %v3138_v58 }
 0x131   : > { %v991_v59 = vmul.f32 %v975_v62, %v861_v19  ;;  %v998_v53 = vpack.c.bf16 %v990_v27, %v988_v38 }
 0x133   : > { %v999_v21 = vpack.c.bf16 %v991_v59, %v989_v51  ;;  %2086 = vmatpush3.bf16.msra.mxu1 %v2204_v10 }
 0x134   : > { %2087 = vmatprep.subr.bf16.mxu1 %v3138_v58 }
 0x135   : > { %1184 = vmatprep.mubr.bf16.mxu0 %v999_v21 }
 0x136   : > { %1185 = vmatmul.mubr.bf16.gmra.mxu0 %v998_v53 }
 0x137   : > { %2088 = vmatpush3.bf16.msra.mxu1 %v2205_v6 }
 0x138   : > { %2089 = vmatprep.subr.bf16.mxu1 %v3138_v58 }
 0x13b   : > { %2090 = vmatpush3.bf16.msra.mxu1 %v2206_v9 }
 0x13c   : > { %2091 = vmatprep.subr.bf16.mxu1 %v3138_v58 }
 0x13f   : > { %2092 = vmatpush3.bf16.msra.mxu1 %v2207_v28 }
 0x140   : > { %2093 = vmatprep.subr.bf16.mxu1 %v3138_v58 }
 0x143   : > { %2094 = vmatpush3.bf16.msra.mxu1 %v2208_v46 }
 0x144   : > { %2095 = vmatprep.subr.bf16.mxu1 %v3138_v58 }
 0x147   : > { %2096 = vmatpush3.bf16.msra.mxu1 %v2209_v30 }
 0x148   : > { %2097 = vmatprep.subr.bf16.mxu1 %v3138_v58 }
 0x14b   : > { %2098 = vmatpush3.bf16.msra.mxu1 %v2210_v8 }
 0x14c   : > { %2103 = vmatprep.subr.bf16.mxu1 %v3138_v58 }
 0x1dd   : > { %v2047_v5 = vpop.f32.mrf.mxu0 }
 0x1df   : > { %v2048_v25 = vpop.f32.mrf.mxu0 }
 0x1e0   : > { %v2852_v41 = vadd.f32 %v2048_v25, %v2047_v5 }
 0x1e1   : > { %v2050_v7 = vpop.f32.mrf.mxu0 }
 0x1e2   : > { %v2856_v56 = vcombine.high %v2852_v41, %v2852_v41  ;;  %v1218_v11 = vsel %vm1217_vm1, %v2852_v41, 0.0 }
 0x1e3   : > { %v1219_v55 = vrot.slane %v1218_v11, 4  ;;  %v2051_v24 = vpop.f32.mrf.mxu0 }
 0x1e4   : > { %v1225_v40 = vsel %vm1217_vm1, %v2856_v56, 0.0  ;;  %v2862_v2 = vadd.f32 %v2051_v24, %v2050_v7 }
 0x1e5   : > { %v1220_v61 = vadd.f32 %v1219_v55, %v1218_v11  ;;  %v1226_v43 = vrot.slane %v1225_v40, 4  ;;  %v2053_v60 = vpop.f32.mrf.mxu0 }
 0x1e6   : > { %v2866_v23 = vcombine.high %v2862_v2, %v2862_v2  ;;  %v1232_v54 = vsel %vm1217_vm1, %v2862_v2, 0.0 }
 0x1e7   : > { %v1221_v29 = vrot.slane %v1220_v61, 2  ;;  %v1227_v63 = vadd.f32 %v1226_v43, %v1225_v40  ;;  %v1233_v26 = vrot.slane %v1232_v54, 4  ;;  %v2054_v52 = vpop.f32.mrf.mxu0 }
 0x1e8   : > { %v1239_v37 = vsel %vm1217_vm1, %v2866_v23, 0.0  ;;  %v2872_v45 = vadd.f32 %v2054_v52, %v2053_v60 }
 0x1e9   : > { %v1222_v57 = vadd.f32 %v1221_v29, %v1220_v61  ;;  %v1228_v39 = vrot.slane %v1227_v63, 2  ;;  %v1234_v42 = vadd.f32 %v1233_v26, %v1232_v54  ;;  %v1240_v20 = vrot.slane %v1239_v37, 4  ;;  %v2056_v62 = vpop.f32.mrf.mxu0 }
 0x1ea   : > { %v2876_v27 = vcombine.high %v2872_v45, %v2872_v45  ;;  %v1246_v19 = vsel %vm1217_vm1, %v2872_v45, 0.0 }
 0x1eb   : > { %v1223_v51 = vrot.slane %v1222_v57, 1  ;;  %v1229_v59 = vadd.f32 %v1228_v39, %v1227_v63  ;;  %v1235_v38 = vrot.slane %v1234_v42, 2  ;;  %v1241_v21 = vadd.f32 %v1240_v20, %v1239_v37  ;;  %v2057_v53 = vpop.f32.mrf.mxu0 }
 0x1ec   : > { %v1247_v44 = vrot.slane %v1246_v19, 4  ;;  %v1253_v10 = vsel %vm1217_vm1, %v2876_v27, 0.0  ;;  %v2882_v6 = vadd.f32 %v2057_v53, %v2056_v62 }
 0x1ed   : > { %v1224_v9 = vadd.f32 %v1223_v51, %v1222_v57  ;;  %v1230_v28 = vrot.slane %v1229_v59, 1  ;;  %v1236_v46 = vadd.f32 %v1235_v38, %v1234_v42  ;;  %v1242_v30 = vrot.slane %v1241_v21, 2 }
 0x1ee   : > { %v1248_v8 = vadd.f32 %v1247_v44, %v1246_v19  ;;  %v1254_v5 = vrot.slane %v1253_v10, 4  ;;  %v2886_v25 = vcombine.high %v2882_v6, %v2882_v6  ;;  %v1260_v7 = vsel %vm1217_vm1, %v2882_v6, 0.0  ;;  %v2059_v11 = vpop.f32.mrf.mxu0 }
 0x1ef   : > { %v1231_v55 = vadd.f32 %v1230_v28, %v1229_v59  ;;  %v1331_v24 = vmul.f32 0.25, %v1224_v9  ;;  %v1237_v40 = vrot.slane %v1236_v46, 1  ;;  %v1243_v61 = vadd.f32 %v1242_v30, %v1241_v21 }
 0x1f0   : > { %v1249_v43 = vrot.slane %v1248_v8, 2  ;;  %v1255_v60 = vadd.f32 %v1254_v5, %v1253_v10  ;;  %v1261_v54 = vrot.slane %v1260_v7, 4  ;;  %v1267_v29 = vsel %vm1217_vm1, %v2886_v25, 0.0  ;;  %v2060_v63 = vpop.f32.mrf.mxu0 }
 0x1f1   : > { %v1332_v26 = vmul.f32 0.25, %v1231_v55  ;;  %v1347_v52 = vpack.c.bf16 %v1331_v24, %v1331_v24  ;;  %v1238_v37 = vadd.f32 %v1237_v40, %v1236_v46  ;;  %v1244_v57 = vrot.slane %v1243_v61, 1 }
 0x1f2   : > { %v1250_v39 = vadd.f32 %v1249_v43, %v1248_v8  ;;  %v1256_v42 = vrot.slane %v1255_v60, 2  ;;  %v1262_v20 = vadd.f32 %v1261_v54, %v1260_v7  ;;  %v1268_v62 = vrot.slane %v1267_v29, 4  ;;  %v2062_v19 = vpop.f32.mrf.mxu0 }
 0x1f3   : > { %v1348_v51 = vpack.c.bf16 %v1332_v26, %v1332_v26  ;;  %v1395_v59 = vunpack.c.l.b16 %v1347_v52  ;;  %v1245_v38 = vadd.f32 %v1244_v57, %v1243_v61  ;;  %v1333_v21 = vmul.f32 0.25, %v1238_v37 }
 0x1f4   : > { %v1251_v53 = vrot.slane %v1250_v39, 1  ;;  %v1257_v44 = vadd.f32 %v1256_v42, %v1255_v60  ;;  %v1263_v10 = vrot.slane %v1262_v20, 2  ;;  %v1269_v9 = vadd.f32 %v1268_v62, %v1267_v29  ;;  %v2063_v28 = vpop.f32.mrf.mxu0 }
 0x1f5   : > { %v1396_v30 = vunpack.c.l.b16 %v1348_v51  ;;  %v1334_v5 = vmul.f32 0.25, %v1245_v38  ;;  %v1349_v55 = vpack.c.bf16 %v1333_v21, %v1333_v21  ;;  %v2892_v24 = vadd.f32 %v2060_v63, %v2059_v11 }
 0x1f6   : > { %v1252_v46 = vadd.f32 %v1251_v53, %v1250_v39  ;;  %v1258_v8 = vrot.slane %v1257_v44, 1  ;;  %v1264_v40 = vadd.f32 %v1263_v10, %v1262_v20  ;;  %v1270_v7 = vrot.slane %v1269_v9, 2  ;;  %v2065_v43 = vpop.f32.mrf.mxu0 }
 0x1f7   : > { %v1350_v54 = vpack.c.bf16 %v1334_v5, %v1334_v5  ;;  %v1397_v26 = vunpack.c.l.b16 %v1349_v55  ;;  %v2896_v61 = vcombine.high %v2892_v24, %v2892_v24  ;;  %v1412_v60 = vsel %vm1411_vm2, %v1396_v30, %v1395_v59 }
 0x1f8   : > { %v1259_v29 = vadd.f32 %v1258_v8, %v1257_v44  ;;  %v1335_v52 = vmul.f32 0.25, %v1252_v46  ;;  %v1271_v37 = vadd.f32 %v1270_v7, %v1269_v9  ;;  %v2066_v57 = vpop.f32.mrf.mxu0  ;;  %v1274_v11 = vsel %vm1217_vm1, %v2892_v24, 0.0 }
 0x1f9   : > { %v1281_v63 = vsel %vm1217_vm1, %v2896_v61, 0.0  ;;  %v1398_v39 = vunpack.c.l.b16 %v1350_v54  ;;  %v1265_v20 = vrot.slane %v1264_v40, 1  ;;  %v1414_v51 = vsel %vm1413_vm3, %v1397_v26, %v1412_v60 }
 0x1fa   : > { %v2903_v42 = vmul.f32 0.25, %v1259_v29  ;;  %v2068_v62 = vpop.f32.mrf.mxu0  ;;  %v1275_v38 = vrot.slane %v1274_v11, 4  ;;  %v1282_v59 = vrot.slane %v1281_v63, 4  ;;  %v2906_v21 = vadd.f32 %v2063_v28, %v2062_v19 }
 0x1fb   : > { %v1351_v53 = vpack.c.bf16 %v1335_v52, %v1335_v52  ;;  %v1272_v44 = vrot.slane %v1271_v37, 1  ;;  %v2915_v55 = vsel %vm1415_vm4, %v1398_v39, %v1414_v51  ;;  %v1266_v8 = vadd.f32 %v1265_v20, %v1264_v40 }
 0x1fc   : > { %3145 = vst [vmem:[#allocation2_spill] sm:$0xff] %v2906_v21  ;;  %v1276_v10 = vadd.f32 %v1275_v38, %v1274_v11  ;;  %v1283_v9 = vadd.f32 %v1282_v59, %v1281_v63  ;;  %v2910_v30 = vcombine.high %v2906_v21, %v2906_v21  ;;  %v1288_v5 = vsel %vm1217_vm1, %v2906_v21, 0.0  ;;  %v2069_v19 = vpop.f32.mrf.mxu0 }
 0x1fd   : > { %v1289_v54 = vrot.slane %v1288_v5, 4  ;;  %v2921_v60 = vunpack.c.l.b16 %v1351_v53  ;;  %v1273_v29 = vadd.f32 %v1272_v44, %v1271_v37  ;;  %v2923_v11 = vadd.f32 %v2066_v57, %v2065_v43 }
 0x1fe   : > { %3146 = vst [vmem:[#allocation3_spill] sm:$0xff] %v2910_v30  ;;  %v1277_v28 = vrot.slane %v1276_v10, 2  ;;  %v1284_v7 = vrot.slane %v1283_v9, 2  ;;  %v1295_v26 = vsel %vm1217_vm1, %v2910_v30, 0.0  ;;  %v2925_v38 = vadd.f32 %v2069_v19, %v2068_v62 }
 0x1ff   : > { %v1296_v52 = vrot.slane %v1295_v26, 4  ;;  %v1290_v51 = vadd.f32 %v1289_v54, %v1288_v5  ;;  %v2927_v59 = vmul.f32 0.25, %v1266_v8  ;;  %v2931_v20 = vcombine.high %v2923_v11, %v2923_v11 }
 0x200   : > { %v1278_v63 = vadd.f32 %v1277_v28, %v1276_v10  ;;  %v1285_v39 = vadd.f32 %v1284_v7, %v1283_v9  ;;  %3147 = vst [vmem:[#allocation4_spill] sm:$0xff] %v2925_v38  ;;  %v1302_v53 = vsel %vm1217_vm1, %v2923_v11, 0.0  ;;  %v2939_v62 = vcombine.high %v2925_v38, %v2925_v38 }
 0x201   : > { %v1297_v40 = vadd.f32 %v1296_v52, %v1295_v26  ;;  %3148 = vst [vmem:[#allocation5_spill] sm:$0xff] %v2931_v20  ;;  %v1291_v44 = vrot.slane %v1290_v51, 2  ;;  %v1303_v43 = vrot.slane %v1302_v53, 4  ;;  %v1309_v10 = vsel %vm1217_vm1, %v2931_v20, 0.0 }
 0x202   : > { %v1279_v36 = vrot.slane %v1278_v63, 1  ;;  %v1286_v37 = vrot.slane %v1285_v39, 1  ;;  %3149 = vst [vmem:[#allocation6_spill] sm:$0xff] %v2939_v62  ;;  %v1316_v9 = vsel %vm1217_vm1, %v2925_v38, 0.0  ;;  %v1310_v54 = vrot.slane %v1309_v10, 4 }
 0x203   : > { %v1298_v57 = vrot.slane %v1297_v40, 2  ;;  %v1292_v19 = vadd.f32 %v1291_v44, %v1290_v51  ;;  %v1304_v28 = vadd.f32 %v1303_v43, %v1302_v53  ;;  %v1317_v26 = vrot.slane %v1316_v9, 4 }
 0x204   : > { %v1280_v5 = vadd.f32 %v1279_v36, %v1278_v63  ;;  %v1287_v8 = vadd.f32 %v1286_v37, %v1285_v39  ;;  %v1323_v52 = vsel %vm1217_vm1, %v2939_v62, 0.0  ;;  %v1311_v58 = vadd.f32 %v1310_v54, %v1309_v10 }
 0x205   : > { %v1299_v7 = vadd.f32 %v1298_v57, %v1297_v40  ;;  %v1293_v18 = vrot.slane %v1292_v19, 1  ;;  %v1305_v17 = vrot.slane %v1304_v28, 2  ;;  %v1318_v46 = vadd.f32 %v1317_v26, %v1316_v9 }
 0x206   : > { %v1339_v35 = vmul.f32 0.25, %v1280_v5  ;;  %v1340_v22 = vmul.f32 0.25, %v1287_v8  ;;  %v1324_v20 = vrot.slane %v1323_v52, 4  ;;  %v1312_v40 = vrot.slane %v1311_v58, 2 }
 0x207   : > { %v1300_v16 = vrot.slane %v1299_v7, 1  ;;  %v1294_v63 = vadd.f32 %v1293_v18, %v1292_v19  ;;  %v1306_v39 = vadd.f32 %v1305_v17, %v1304_v28  ;;  %v1319_v53 = vrot.slane %v1318_v46, 2 }
 0x208   : > { %v1355_v38 = vpack.c.bf16 %v1339_v35, %v1339_v35  ;;  %v1356_v36 = vpack.c.bf16 %v1340_v22, %v1340_v22  ;;  %v1325_v37 = vadd.f32 %v1324_v20, %v1323_v52  ;;  %v1313_v62 = vadd.f32 %v1312_v40, %v1311_v58 }
 0x209   : > { %v1301_v51 = vadd.f32 %v1300_v16, %v1299_v7  ;;  %v1341_v57 = vmul.f32 0.25, %v1294_v63  ;;  %v1307_v5 = vrot.slane %v1306_v39, 1  ;;  %v1320_v30 = vadd.f32 %v1319_v53, %v1318_v46 }
 0x20a   : > { %v1403_v44 = vunpack.c.l.b16 %v1355_v38  ;;  %v1404_v43 = vunpack.c.l.b16 %v1356_v36  ;;  %v1326_v21 = vrot.slane %v1325_v37, 2  ;;  %v1338_v10 = vmul.f32 0.25, %v1273_v29 }
 0x20b   : > { %v1342_v8 = vmul.f32 0.25, %v1301_v51  ;;  %v1357_v35 = vpack.c.bf16 %v1341_v57, %v1341_v57  ;;  %v1308_v22 = vadd.f32 %v1307_v5, %v1306_v39  ;;  %v1314_v17 = vrot.slane %v1313_v62, 1 }
 0x20c   : > { %v1425_v9 = vsel %vm1411_vm2, %v1404_v43, %v1403_v44  ;;  %v1321_v19 = vrot.slane %v1320_v30, 1  ;;  %v1327_v16 = vadd.f32 %v1326_v21, %v1325_v37  ;;  %v3150_v20 = vpack.c.bf16 %v2903_v42, %v2903_v42 }
 0x20d   : > { %v1358_v18 = vpack.c.bf16 %v1342_v8, %v1342_v8  ;;  %v1353_v28 = vpack.c.bf16 %v2927_v59, %v2927_v59  ;;  %v1405_v7 = vunpack.c.l.b16 %v1357_v35  ;;  %v1343_v58 = vmul.f32 0.25, %v1308_v22 }
 0x20e   : > { %v1400_v38 = vunpack.c.l.b16 %v3150_v20  ;;  %v1315_v54 = vadd.f32 %v1314_v17, %v1313_v62  ;;  %v1322_v29 = vadd.f32 %v1321_v19, %v1320_v30  ;;  %v1328_v26 = vrot.slane %v1327_v16, 1  ;;  %v2212_v20 = vld [vmem:[%s3119_s7] sm:$0xff]  }
 0x20f   : > { %v1406_v46 = vunpack.c.l.b16 %v1358_v18  ;;  %v1418_v52 = vsel %vm1417_vm5, %v2921_v60, %v2915_v55  ;;  %v1354_v36 = vpack.c.bf16 %v1338_v10, %v1338_v10  ;;  %v1426_v21 = vsel %vm1413_vm3, %v1405_v7, %v1425_v9 }
 0x210   : > { %v1359_v63 = vpack.c.bf16 %v1343_v58, %v1343_v58  ;;  %v1344_v39 = vmul.f32 0.25, %v1315_v54  ;;  %v1329_v51 = vadd.f32 %v1328_v26, %v1327_v16  ;;  %v1345_v40 = vmul.f32 0.25, %v1322_v29  ;;  %v2211_v16 = vld [vmem:[%s3119_s7 + $0x8] sm:$0xff]  }
 0x211   : > { %v1427_v42 = vsel %vm1415_vm4, %v1406_v46, %v1426_v21  ;;  %v1401_v59 = vunpack.c.l.b16 %v1353_v28  ;;  %v1420_v44 = vsel %vm1419_vm6, %v1400_v38, %v1418_v52  ;;  %v1402_v55 = vunpack.c.l.b16 %v1354_v36 }
 0x212   : > { %v1407_v53 = vunpack.c.l.b16 %v1359_v63  ;;  %v1360_v37 = vpack.c.bf16 %v1344_v39, %v1344_v39  ;;  %v1346_v62 = vmul.f32 0.25, %v1329_v51  ;;  %v1361_v30 = vpack.c.bf16 %v1345_v40, %v1345_v40 }
 0x213   : > { %v1422_v8 = vsel %vm1421_vm7, %v1401_v59, %v1420_v44  ;;  %v3151_v19 = vmov 0.0   ;;  %v2344_v59 = vmov 1966171168  }
 0x214   : > { %v1428_v43 = vsel %vm1417_vm5, %v1407_v53, %v1427_v42  ;;  %v1408_v60 = vunpack.c.l.b16 %v1360_v37  ;;  %v1362_v57 = vpack.c.bf16 %v1346_v62, %v1346_v62  ;;  %v1409_v5 = vunpack.c.l.b16 %v1361_v30 }
 0x215   : > { %v1424_v22 = vsel %vm1423_vm8, %v1402_v55, %v1422_v8  ;;  %v1603_v53 = vunpack.c.l.s4 %v2344_v59  ;;  %v1605_v37 = vlaneseq  ;;  %v3153_v8 = vunpack.c.l.bf16 %v2460_v13 }
 0x216   : > { %v1410_v10 = vunpack.c.l.b16 %v1362_v57  ;;  %v1429_v9 = vsel %vm1419_vm6, %v1408_v60, %v1428_v43  ;;  %v2971_v43 = vld [vmem:[%s3120_s8] ss:$0 sm:$0xff]  ;;  %v3152_v57 = vunpack.c.l.bf16 %v2457_v12 }
 0x217   : > { %v1430_v35 = vsel %vm1421_vm7, %v1409_v5, %v1429_v9  ;;  %v1604_v30 = vunpack.c.0.s8 %v1603_v53  ;;  %v1606_v44 = vshrl.u32 %v1605_v37, 7  ;;  %v3154_v9 = vunpack.c.l.bf16 %v2463_v14 }
 0x218   : > { %v1431_v18 = vsel %vm1423_vm8, %v1410_v10, %v1430_v35  ;;  %v1802_v5 = vmul.f32 %v2971_v43, %v3152_v57  ;;  %v1803_v10 = vmul.f32 %v2971_v43, %v3153_v8  ;;  %v3158_v14 = vunpack.c.l.bf16 %v2514_v33 }
 0x219   : > { %v1432_v17 = vpack.c.b16 %v1431_v18, %v1424_v22  ;;  %v2973_v55 = vsub.s32 %v1604_v30, %v1606_v44  ;;  %v1804_v35 = vmul.f32 %v2971_v43, %v3154_v9 }
 0x21b   : > { %2100 = vmatmul.mubr.bf16.vlgmr.msra.gmra.mxu1 %v1432_v17  ;;  %v3155_v17 = vunpack.c.l.bf16 %v2466_v15 }
 0x21c   : > { %2107 = vmatprep.mubr.msk.bf16.mxu1 %vm2343_vm0, %v3151_v19  ;;  %2104 = vmatpush3.bf16.msra.mxu1 %v2211_v16  ;;  %v3156_v16 = vunpack.c.l.bf16 %v2508_v31  ;;  %v3159_v31 = vunpack.c.l.bf16 %v2517_v34 }
 0x21d   : > { %2105 = vmatprep.subr.bf16.mxu1 %v3151_v19  ;;  %v1805_v19 = vmul.f32 %v2971_v43, %v3155_v17 }
 0x21e   : > { %v1806_v12 = vmul.f32 %v2971_v43, %v3156_v16 }
 0x220   : > { %2106 = vmatpush3.bf16.msra.mxu1 %v2212_v20  ;;  %v3157_v20 = vunpack.c.l.bf16 %v2511_v32  ;;  %v3160_v32 = vunpack.c.l.bf16 %v2548_v47  ;;  %v3163_v47 = vunpack.c.l.bf16 %v2557_v50 }
 0x222   : > { %v1807_v13 = vmul.f32 %v2971_v43, %v3157_v20 }
 0x2db   : > { %v1516_v38 = vpop.f32.mrf.mxu1 }
 0x2dc   : > { %v1523_v58 = vmax.f32 %v1516_v38, 0.0  ;;  %v2994_v38 = vsub.s32 0, %v1606_v44 }
 0x2dd   : > { %v2101_v28 = vpop.f32.mrf.mxu1 }
 0x2de   : > { %v1808_v28 = vmul.f32 %v2971_v43, %v3158_v14 }
 0x2df   : > { %v1519_v7 = vpop.f32.mrf.mxu1 }
 0x2e0   : > { %v1524_v46 = vmax.f32 %v1519_v7, 0.0 }
 0x2e1   : > { %v2102_v54 = vpop.f32.mrf.mxu1 }
 0x2e2   : > { %v1525_v29 = vpack.c.bf16 %v1524_v46, %v1523_v58  ;;  %v1809_v54 = vmul.f32 %v2971_v43, %v3159_v31 }
 0x2e4   : > { %2108 = vmatmul.mubr.msk.bf16.vlgmr.msra.gmra.mxu1 %vm1542_vm9, %v1525_v29  ;;  %v3007_v29 = vmul.f32 %v2971_v43, %v3160_v32 }
 0x3a4   : > { %v1580_v26 = vpop.f32.mrf.mxu1 }
 0x3a5   : > { %v2024_v52 = vmul.f32 -1.442695, %v1580_v26  ;;  %v3161_v26 = vunpack.c.l.bf16 %v2551_v48 }
 0x3a6   : > { %v2109_v36 = vpop.f32.mrf.mxu1 }
 0x3a7   : > { %2309 = vpow2.f32 %v2024_v52  ;;  %v3012_v33 = vmul.f32 %v2971_v43, %v3161_v26  ;;  %v3162_v52 = vunpack.c.l.bf16 %v2554_v49 }
 0x3a8   : > { %v1583_v21 = vpop.f32.mrf.mxu1 }
 0x3a9   : > { %v2025_v63 = vmul.f32 -1.442695, %v1583_v21  ;;  %v3017_v36 = vmul.f32 %v2971_v43, %v3162_v52 }
 0x3aa   : > { %v2110_v42 = vpop.f32.mrf.mxu1 }
 0x3ab   : > { %2311 = vpow2.f32 %v2025_v63 }
 0x3b4   : > { %v2310_v39 = vpop.eup %2309 }
 0x3b5   : > { %v1593_v51 = vadd.f32 1.0, %v2310_v39  ;;  %v3024_v39 = vmul.f32 %v2971_v43, %v3163_v47 }
 0x3b7   : > { %2313 = vrcp.f32 %v1593_v51 }
 0x3b8   : > { %v2312_v40 = vpop.eup %2311 }
 0x3b9   : > { %v1594_v62 = vadd.f32 1.0, %v2312_v40 }
 0x3bb   : > { %2315 = vrcp.f32 %v1594_v62 }
 0x3c4   : > { %v2314_v60 = vpop.eup %2313 }
 0x3c5   : > { %v1601_v22 = vcombine.high %v2314_v60, %v2314_v60  ;;  %v1608_v18 = vrot.slane %v2314_v60, %v2973_v55 }
 0x3c7   : > { %v1615_v7 = vrot.slane %v1601_v22, %v2973_v55  ;;  %v1616_v15 = vcombine.high %v1608_v18, %v1608_v18  ;;  %v1624_v58 = vrot.slane %v1608_v18, %v2973_v55 }
 0x3c8   : > { %v2316_v46 = vpop.eup %2315 }
 0x3c9   : > { %v1617_v21 = vcombine.high %v1615_v7, %v1615_v7  ;;  %v1631_v34 = vrot.slane %v1615_v7, %v2973_v55  ;;  %v1638_v63 = vrot.slane %v1616_v15, %v2973_v55  ;;  %v1646_v42 = vcombine.high %v1624_v58, %v1624_v58 }
 0x3ca   : > { %v1702_v48 = vrot.slane %v1624_v58, %v2994_v38  ;;  %v1650_v51 = vcombine.high %v2316_v46, %v2316_v46  ;;  %v1657_v49 = vrot.slane %v2316_v46, %v2973_v55 }
 0x3cb   : > { %v1645_v40 = vrot.slane %v1617_v21, %v2973_v55  ;;  %v1647_v59 = vcombine.high %v1631_v34, %v1631_v34  ;;  %v1648_v53 = vcombine.high %v1638_v63, %v1638_v63  ;;  %v1706_v37 = vrot.slane %v1638_v63, %v2994_v38 }
 0x3cc   : > { %v1710_v62 = vrot.slane %v1646_v42, %v2994_v38  ;;  %v1718_v30 = vrot.slane %v1631_v34, %v2994_v38  ;;  %v1779_v50 = vmul.f32 %v2852_v41, %v1702_v48  ;;  %v1664_v44 = vrot.slane %v1650_v51, %v2973_v55 }
 0x3cd   : > { %v1649_v60 = vcombine.high %v1645_v40, %v1645_v40  ;;  %v1714_v57 = vrot.slane %v1648_v53, %v2994_v38  ;;  %v1722_v8 = vrot.slane %v1645_v40, %v2994_v38  ;;  %v1726_v9 = vrot.slane %v1647_v59, %v2994_v38  ;;  %v3168_v59 = vld [vmem:[#allocation2_spill] sm:$0xff] }
 0x3ce   : > { %v1780_v22 = vmul.f32 %v1706_v37, %v2856_v56  ;;  %v1781_v18 = vmul.f32 %v2862_v2, %v1710_v62  ;;  %v1783_v41 = vmul.f32 %v2872_v45, %v1718_v30  ;;  %v1818_v17 = vadd.f32 %v1802_v5, %v1779_v50  ;;  %v3169_v37 = vld [vmem:[#allocation3_spill] sm:$0xff]  ;;  %v3170_v30 = vld [vmem:[#allocation5_spill] sm:$0xff] }
 0x3cf   : > { %v1730_v16 = vrot.slane %v1649_v60, %v2994_v38  ;;  %v1782_v20 = vmul.f32 %v1714_v57, %v2866_v23  ;;  %v1784_v14 = vmul.f32 %v1722_v8, %v2876_v27  ;;  %v1785_v7 = vmul.f32 %v2882_v6, %v1726_v9  ;;  %v3172_v57 = vld [vmem:[#allocation6_spill] sm:$0xff] }
 0x3d0   : > { %v1819_v15 = vadd.f32 %v1803_v10, %v1780_v22  ;;  %v1820_v58 = vadd.f32 %v1804_v35, %v1781_v18  ;;  %v1822_v46 = vadd.f32 %v1806_v12, %v1783_v41  ;;  %1834 = vst [vmem:[%s3038_s13] sm:$0xf] %v1818_v17  ;;  %v1665_v56 = vcombine.high %v1657_v49, %v1657_v49 }
 0x3d1   : > { %v1786_v2 = vmul.f32 %v1730_v16, %v2886_v25  ;;  %v1821_v45 = vadd.f32 %v1805_v19, %v1782_v20  ;;  %v1823_v5 = vadd.f32 %v1807_v13, %v1784_v14  ;;  %v1824_v31 = vadd.f32 %v1808_v28, %v1785_v7 }
 0x3d2   : > { %1835 = vst [vmem:[%s3038_s13 + $0x4] sm:$0xf] %v1819_v15  ;;  %1836 = vst [vmem:[%s3038_s13 + $0x8] sm:$0xf] %v1820_v58  ;;  %v1666_v23 = vcombine.high %v1664_v44, %v1664_v44  ;;  %v1673_v27 = vrot.slane %v1657_v49, %v2973_v55  ;;  %v1680_v6 = vrot.slane %v1664_v44, %v2973_v55  ;;  %v3164_v35 = vunpack.c.l.bf16 %v2591_v0  ;;  %v3171_v44 = vld [vmem:[#allocation4_spill] sm:$0xff] }
 0x3d3   : > { %1838 = vst [vmem:[%s3038_s13 + $0x10] sm:$0xf] %v1822_v46  ;;  %v1687_v10 = vrot.slane %v1665_v56, %v2973_v55  ;;  %v3165_v19 = vunpack.c.l.bf16 %v2594_v1  ;;  %v3166_v13 = vunpack.c.l.bf16 %v2597_v3  ;;  %v1825_v32 = vadd.f32 %v1809_v54, %v1786_v2  ;;  %1837 = vst [vmem:[%s3038_s13 + $0xc] sm:$0xf] %v1821_v45 }
 0x3d4   : > { %v1814_v25 = vmul.f32 %v2971_v43, %v3164_v35  ;;  %1839 = vst [vmem:[%s3038_s13 + $0x14] sm:$0xf] %v1823_v5  ;;  %1840 = vst [vmem:[%s3038_s13 + $0x18] sm:$0xf] %v1824_v31  ;;  %v1694_v26 = vrot.slane %v1666_v23, %v2973_v55  ;;  %v1695_v52 = vcombine.high %v1673_v27, %v1673_v27  ;;  %v3167_v0 = vunpack.c.l.bf16 %v2600_v4 }
 0x3d5   : > { %v1815_v12 = vmul.f32 %v2971_v43, %v3165_v19  ;;  %v1816_v28 = vmul.f32 %v2971_v43, %v3166_v13  ;;  %v1696_v21 = vcombine.high %v1680_v6, %v1680_v6  ;;  %v1697_v34 = vcombine.high %v1687_v10, %v1687_v10  ;;  %1841 = vst [vmem:[%s3038_s13 + $0x1c] sm:$0xf] %v1825_v32 }
 0x3d6   : > { %v1817_v63 = vmul.f32 %v2971_v43, %v3167_v0  ;;  %v1734_v1 = vrot.slane %v1673_v27, %v2994_v38  ;;  %v1738_v3 = vrot.slane %v1687_v10, %v2994_v38  ;;  %v1750_v42 = vrot.slane %v1680_v6, %v2994_v38 }
 0x3d7   : > { %v1698_v54 = vcombine.high %v1694_v26, %v1694_v26  ;;  %v1742_v47 = vrot.slane %v1695_v52, %v2994_v38  ;;  %v1746_v48 = vrot.slane %v1697_v34, %v2994_v38  ;;  %v1754_v55 = vrot.slane %v1694_v26, %v2994_v38 }
 0x3d8   : > { %v1758_v51 = vrot.slane %v1696_v21, %v2994_v38  ;;  %v1787_v4 = vmul.f32 %v2892_v24, %v1734_v1  ;;  %v1788_v43 = vmul.f32 %v1738_v3, %v2896_v61  ;;  %v1791_v49 = vmul.f32 %v2923_v11, %v1750_v42 }
 0x3d9   : > { %v1762_v40 = vrot.slane %v1698_v54, %v2994_v38  ;;  %v1789_v53 = vmul.f32 %v3168_v59, %v1742_v47  ;;  %v1790_v62 = vmul.f32 %v1746_v48, %v3169_v37  ;;  %v1792_v50 = vmul.f32 %v1754_v55, %v3170_v30 }
 0x3da   : > { %v1793_v24 = vmul.f32 %v3171_v44, %v1758_v51  ;;  %v1826_v61 = vadd.f32 %v3007_v29, %v1787_v4  ;;  %v1827_v11 = vadd.f32 %v3012_v33, %v1788_v43  ;;  %v1830_v60 = vadd.f32 %v1814_v25, %v1791_v49 }
 0x3db   : > { %v1794_v38 = vmul.f32 %v1762_v40, %v3172_v57  ;;  %v1828_v8 = vadd.f32 %v3017_v36, %v1789_v53  ;;  %v1829_v9 = vadd.f32 %v3024_v39, %v1790_v62  ;;  %v1831_v22 = vadd.f32 %v1815_v12, %v1792_v50 }
 0x3dc   : > { %v1832_v18 = vadd.f32 %v1816_v28, %v1793_v24  ;;  %1842 = vst [vmem:[%s3038_s13 + $0x20] sm:$0xf] %v1826_v61  ;;  %1843 = vst [vmem:[%s3038_s13 + $0x24] sm:$0xf] %v1827_v11 }
 0x3dd   : > { %1846 = vst [vmem:[%s3038_s13 + $0x30] sm:$0xf] %v1830_v60  ;;  %v1833_v41 = vadd.f32 %v1817_v63, %v1794_v38  ;;  %1844 = vst [vmem:[%s3038_s13 + $0x28] sm:$0xf] %v1828_v8 }
 0x3de   : > { %1845 = vst [vmem:[%s3038_s13 + $0x2c] sm:$0xf] %v1829_v9  ;;  %1847 = vst [vmem:[%s3038_s13 + $0x34] sm:$0xf] %v1831_v22 }
 0x3df   : > { %1848 = vst [vmem:[%s3038_s13 + $0x38] sm:$0xf] %v1832_v18  ;;  %1849 = vst [vmem:[%s3038_s13 + $0x3c] sm:$0xf] %v1833_v41 }
 0x3e0 PF: > { %s19_s11 = sadd.s32 1, %s2339_s11   ;;  %s3173_s30 = smov %s2335_s10 }
 0x3e1   : > { %p16_p5 = scmp.ge.s32.totalorder %s19_s11, 4   ;;  %s3174_s10 = smov %s3176_s12 }
 0x3e3   :  { %18 = sbr.rel (!%p16_p5) target bundleno = 2 (0x2), region = 86 }

// kernel: ts_block_forward.2
= control target key start
LH: loop header
LB: loop body
LE: loop exit
PB: predicated region body
PF: predicated region fallthrough
CT: control target
= control target key end

     0   :  { %s2033_s30 = smov 0   ;;  %s2035_s10 = smov 0   ;;  %s2577_s0 = inlined_call_operand.vmem [shape: f32[2,16,4,128], index: 0, kind: input, shape index: {}]   ;;  %s2578_s1 = inlined_call_operand.vmem [shape: f32[1,128], index: 1, kind: input, shape index: {}]   ;;  %s2579_s2 = inlined_call_operand.vmem [shape: f32[1,128], index: 2, kind: input, shape index: {}]   ;;  %s2580_s3 = inlined_call_operand.vmem [shape: f32[1,128], index: 3, kind: input, shape index: {}]   ;;  %s2581_s4 = inlined_call_operand.vmem [shape: bf16[128,512], index: 4, kind: input, shape index: {}]   ;;  %s2582_s5 = inlined_call_operand.vmem [shape: bf16[256,128], index: 5, kind: input, shape index: {}]   ;;  %s2583_s6 = inlined_call_operand.vmem [shape: bf16[128,32], index: 6, kind: input, shape index: {}]   ;;  %s2584_s7 = inlined_call_operand.vmem [shape: bf16[32,128], index: 7, kind: input, shape index: {}]   ;;  %s2585_s8 = inlined_call_operand.vmem [shape: f32[1,128], index: 8, kind: input, shape index: {}]   ;;  %s2586_s9 = inlined_call_operand.vmem [shape: bf16[2,16,4,128], index: 9, kind: output, shape index: {}]  }
   0x1   :  { %s2037_s11 = smov 0  }
   0x2 LB: > { %s31_s12 = sadd.s32 1, %s1974_s10  ;;  %p1574_p0 = scmp.ge.s32.totalorder %s1978_s11, 1  ;;  %s1978_s11 = sphi %s2037_s11, %s19_s11   ;;  %s1974_s10 = sphi %s2035_s10, %s2588_s10   ;;  %s1970_s30 = sphi %s2033_s30, %s2587_s30  }
   0x3   : > { %p33_p1 = scmp.ge.s32.totalorder %s31_s12, 2  ;;  %p306_p2 = scmp.lt.s32.totalorder %s1978_s11, 3 }
   0x5   : > { %s2590_s12 = smov (%p33_p1, %s31_s12), 0  ;;  %p307_p3 = pnand %p1574_p0, %p306_p2 }
   0x6   : > { %p348_p4 = scmp.lt.s32.totalorder (!%p307_p3), %s1970_s30, 1 }
   0x7   : > { %310 = sbr.rel (%p307_p3) target bundleno = 960 (0x3c0), region = 56 }
   0xc   : > { %v1770_v0 = vld [vmem:[%s2581_s4 + $0xe4] ss:$16 sps:$4 sm:$0xff]   ;;  %v1772_v1 = vld [vmem:[%s2581_s4 + $0xe0] ss:$16 sps:$4 sm:$0xff]   ;;  %v1980_v2 = vmov 0   ;;  %s2592_s30 = smov (!%p348_p4, %s1970_s30), 1 }
   0xd   : > { %726 = vmatprep.mubr.bf16.mxu0 %v1980_v2  ;;  %799 = vmatprep.mubr.bf16.mxu1 %v1980_v2  ;;  %v1773_v3 = vld [vmem:[%s2581_s4 + $0xc4] ss:$16 sps:$4 sm:$0xff]   ;;  %v1775_v4 = vld [vmem:[%s2581_s4 + $0xc0] ss:$16 sps:$4 sm:$0xff]   ;;  %s1661_s23 = sshll.u32 %s2592_s30, 6  ;;  %vm1982_vm0 = vmmov 0  }
   0xe   : > { %694 = vmatprep.subr.bf16.mxu0 %v1770_v0  ;;  %v1776_v5 = vld [vmem:[%s2581_s4 + $0xa4] ss:$16 sps:$4 sm:$0xff]   ;;  %v1778_v6 = vld [vmem:[%s2581_s4 + $0xa0] ss:$16 sps:$4 sm:$0xff]   ;;  %s2080_s13 = scalar_lea.vmem %s2577_s0, %s1661_s23  ;;  %v1793_v10 = vld [vmem:[%s2581_s4 + $0xec] ss:$16 sps:$4 sm:$0xff]  }
   0xf   : > { %695 = vmatpush1.bf16.msra.mxu0 %v1772_v1  ;;  %v1779_v7 = vld [vmem:[%s2581_s4 + $0x84] ss:$16 sps:$4 sm:$0xff]   ;;  %v1781_v8 = vld [vmem:[%s2581_s4 + $0x80] ss:$16 sps:$4 sm:$0xff]   ;;  %v1796_v11 = vld [vmem:[%s2581_s4 + $0xe8] ss:$16 sps:$4 sm:$0xff]   ;;  %767 = vmatprep.subr.bf16.mxu1 %v1793_v10 }
  0x10   : > { %696 = vmatprep.subr.bf16.mxu0 %v1773_v3  ;;  %v1782_v9 = vld [vmem:[%s2581_s4 + $0x64] ss:$16 sps:$4 sm:$0xff]   ;;  %v365_v12 = vld [vmem:[%s2080_s13] sm:$0xf]  ;;  %v367_v14 = vld [vmem:[%s2080_s13 + $0x8] sm:$0xf]  ;;  %768 = vmatpush1.bf16.msra.mxu1 %v1796_v11 }
  0x11   : > { %v366_v13 = vld [vmem:[%s2080_s13 + $0x4] sm:$0xf]  ;;  %v368_v15 = vld [vmem:[%s2080_s13 + $0xc] sm:$0xf]  ;;  %v2101_v16 = vld [vmem:[%s2578_s1] ss:$0 sm:$0xff] }
  0x12   : > { %v1784_v17 = vld [vmem:[%s2581_s4 + $0x60] ss:$16 sps:$4 sm:$0xff]   ;;  %v1785_v18 = vld [vmem:[%s2581_s4 + $0x44] ss:$16 sps:$4 sm:$0xff]   ;;  %v388_v19 = vmul.f32 %v2101_v16, %v365_v12  ;;  %v389_v20 = vmul.f32 %v2101_v16, %v366_v13  ;;  %v390_v21 = vmul.f32 %v2101_v16, %v367_v14  ;;  %v391_v22 = vmul.f32 %v2101_v16, %v368_v15  ;;  %v1797_v23 = vld [vmem:[%s2581_s4 + $0xcc] ss:$16 sps:$4 sm:$0xff]  }
  0x13   : > { %697 = vmatpush1.bf16.msra.mxu0 %v1775_v4  ;;  %v1799_v24 = vld [vmem:[%s2581_s4 + $0xc8] ss:$16 sps:$4 sm:$0xff]   ;;  %v1800_v25 = vld [vmem:[%s2581_s4 + $0xac] ss:$16 sps:$4 sm:$0xff]   ;;  %769 = vmatprep.subr.bf16.mxu1 %v1797_v23  ;;  %v369_v27 = vld [vmem:[%s2080_s13 + $0x10] sm:$0xf] }
  0x14   : > { %698 = vmatprep.subr.bf16.mxu0 %v1776_v5  ;;  %1844 = vtanh.f32 %v388_v19  ;;  %v1802_v26 = vld [vmem:[%s2581_s4 + $0xa8] ss:$16 sps:$4 sm:$0xff]   ;;  %v370_v28 = vld [vmem:[%s2080_s13 + $0x14] sm:$0xf]  ;;  %770 = vmatpush1.bf16.msra.mxu1 %v1799_v24  ;;  %v372_v30 = vld [vmem:[%s2080_s13 + $0x1c] sm:$0xf]  ;;  %v392_v31 = vmul.f32 %v2101_v16, %v369_v27 }
  0x15   : > { %1846 = vtanh.f32 %v389_v20  ;;  %v371_v29 = vld [vmem:[%s2080_s13 + $0x18] sm:$0xf]  ;;  %v393_v32 = vmul.f32 %v2101_v16, %v370_v28  ;;  %v1787_v33 = vld [vmem:[%s2581_s4 + $0x40] ss:$16 sps:$4 sm:$0xff]   ;;  %771 = vmatprep.subr.bf16.mxu1 %v1800_v25  ;;  %v395_v35 = vmul.f32 %v2101_v16, %v372_v30  ;;  %v1803_v36 = vld [vmem:[%s2581_s4 + $0x8c] ss:$16 sps:$4 sm:$0xff]  }
  0x16   : > { %1848 = vtanh.f32 %v390_v21  ;;  %v394_v34 = vmul.f32 %v2101_v16, %v371_v29  ;;  %v1788_v37 = vld [vmem:[%s2581_s4 + $0x24] ss:$16 sps:$4 sm:$0xff]   ;;  %v1805_v38 = vld [vmem:[%s2581_s4 + $0x88] ss:$16 sps:$4 sm:$0xff]   ;;  %v373_v39 = vld [vmem:[%s2080_s13 + $0x20] sm:$0xf] }
  0x17   : > { %699 = vmatpush1.bf16.msra.mxu0 %v1778_v6  ;;  %1850 = vtanh.f32 %v391_v22  ;;  %v374_v40 = vld [vmem:[%s2080_s13 + $0x24] sm:$0xf]  ;;  %v375_v41 = vld [vmem:[%s2080_s13 + $0x28] sm:$0xf]  ;;  %v376_v42 = vld [vmem:[%s2080_s13 + $0x2c] sm:$0xf]  ;;  %v396_v43 = vmul.f32 %v2101_v16, %v373_v39 }
  0x18   : > { %700 = vmatprep.subr.bf16.mxu0 %v1779_v7  ;;  %1852 = vtanh.f32 %v392_v31  ;;  %772 = vmatpush1.bf16.msra.mxu1 %v1802_v26  ;;  %v397_v44 = vmul.f32 %v2101_v16, %v374_v40  ;;  %v1790_v45 = vld [vmem:[%s2581_s4 + $0x20] ss:$16 sps:$4 sm:$0xff]   ;;  %v1806_v46 = vld [vmem:[%s2581_s4 + $0x6c] ss:$16 sps:$4 sm:$0xff]   ;;  %v398_v47 = vmul.f32 %v2101_v16, %v375_v41  ;;  %v399_v48 = vmul.f32 %v2101_v16, %v376_v42  ;;  %v1791_v49 = vld [vmem:[%s2581_s4 + $0x4] ss:$16 sps:$4 sm:$0xff]  }
  0x19   : > { %1854 = vtanh.f32 %v393_v32  ;;  %773 = vmatprep.subr.bf16.mxu1 %v1803_v36  ;;  %v1795_v50 = vld [vmem:[%s2581_s4] ss:$16 sps:$4 sm:$0xff]   ;;  %v1808_v52 = vld [vmem:[%s2581_s4 + $0x68] ss:$16 sps:$4 sm:$0xff]   ;;  %v2177_v54 = vld [vmem:[%s2080_s13 + $0x34] sm:$0xf] }
  0x1a   : > { %1856 = vtanh.f32 %v394_v34  ;;  %v2168_v51 = vld [vmem:[%s2579_s2] ss:$0 sm:$0xff]  ;;  %v2174_v53 = vld [vmem:[%s2080_s13 + $0x30] sm:$0xf]  ;;  %v2180_v55 = vld [vmem:[%s2080_s13 + $0x38] sm:$0xf]  ;;  %v401_v60 = vmul.f32 %v2101_v16, %v2177_v54 }
  0x1b   : > { %701 = vmatpush1.bf16.msra.mxu0 %v1781_v8  ;;  %1858 = vtanh.f32 %v395_v35  ;;  %v2183_v56 = vld [vmem:[%s2080_s13 + $0x3c] sm:$0xf]  ;;  %v400_v57 = vmul.f32 %v2101_v16, %v2174_v53  ;;  %v2190_v58 = vld [vmem:[%s2580_s3] ss:$0 sm:$0xff]  ;;  %v1811_v61 = vld [vmem:[%s2581_s4 + $0x48] ss:$16 sps:$4 sm:$0xff]   ;;  %v402_v62 = vmul.f32 %v2101_v16, %v2180_v55 }
  0x1c   : > { %702 = vmatprep.subr.bf16.mxu0 %v1782_v9  ;;  %1860 = vtanh.f32 %v396_v43  ;;  %774 = vmatpush1.bf16.msra.mxu1 %v1805_v38  ;;  %v1809_v59 = vld [vmem:[%s2581_s4 + $0x4c] ss:$16 sps:$4 sm:$0xff]   ;;  %v403_v1 = vmul.f32 %v2101_v16, %v2183_v56  ;;  %v1814_v10 = vld [vmem:[%s2581_s4 + $0x28] ss:$16 sps:$4 sm:$0xff]   ;;  %vm1193_vm1 = vcmask 1043456   ;;  %vm1350_vm2 = vcmask 261120  }
  0x1d   : > { %1862 = vtanh.f32 %v397_v44  ;;  %775 = vmatprep.subr.bf16.mxu1 %v1806_v46  ;;  %v1812_v0 = vld [vmem:[%s2581_s4 + $0x2c] ss:$16 sps:$4 sm:$0xff]   ;;  %v1817_v24 = vld [vmem:[%s2581_s4 + $0x8] ss:$16 sps:$4 sm:$0xff]  }
  0x1e   : > { %1864 = vtanh.f32 %v398_v47  ;;  %v1815_v14 = vld [vmem:[%s2581_s4 + $0xc] ss:$16 sps:$4 sm:$0xff]  }
  0x1f   : > { %703 = vmatpush1.bf16.msra.mxu0 %v1784_v17  ;;  %1866 = vtanh.f32 %v399_v48 }
  0x20   : > { %704 = vmatprep.subr.bf16.mxu0 %v1785_v18  ;;  %776 = vmatpush1.bf16.msra.mxu1 %v1808_v52  ;;  %1868 = vtanh.f32 %v400_v57 }
  0x21   : > { %v1845_v63 = vpop.eup %1844  ;;  %777 = vmatprep.subr.bf16.mxu1 %v1809_v59  ;;  %1870 = vtanh.f32 %v401_v60 }
  0x22   : > { %v1847_v3 = vpop.eup %1846  ;;  %v427_v4 = vmul.f32 %v1845_v63, %v2168_v51  ;;  %1872 = vtanh.f32 %v402_v62 }
  0x23   : > { %705 = vmatpush1.bf16.msra.mxu0 %v1787_v33  ;;  %v1849_v5 = vpop.eup %1848  ;;  %v428_v6 = vmul.f32 %v1847_v3, %v2168_v51  ;;  %1874 = vtanh.f32 %v403_v1 }
  0x24   : > { %706 = vmatprep.subr.bf16.mxu0 %v1788_v37  ;;  %v1851_v7 = vpop.eup %1850  ;;  %v429_v8 = vmul.f32 %v1849_v5, %v2168_v51  ;;  %v450_v9 = vadd.f32 %v2190_v58, %v427_v4  ;;  %778 = vmatpush1.bf16.msra.mxu1 %v1811_v61 }
  0x25   : > { %v1853_v11 = vpop.eup %1852  ;;  %v430_v12 = vmul.f32 %v1851_v7, %v2168_v51  ;;  %v451_v13 = vadd.f32 %v2190_v58, %v428_v6  ;;  %779 = vmatprep.subr.bf16.mxu1 %v1812_v0  ;;  %v1818_v7 = vld [vmem:[%s2582_s5 + $0x78] sm:$0xff]  }
  0x26   : > { %v1855_v15 = vpop.eup %1854  ;;  %v452_v16 = vadd.f32 %v2190_v58, %v429_v8  ;;  %v431_v17 = vmul.f32 %v1853_v11, %v2168_v51  ;;  %v1820_v8 = vld [vmem:[%s2582_s5 + $0x70] sm:$0xff]   ;;  %v1824_v11 = vld [vmem:[%s2582_s5 + $0x60] sm:$0xff]  }
  0x27   : > { %707 = vmatpush1.bf16.msra.mxu0 %v1790_v45  ;;  %v1857_v18 = vpop.eup %1856  ;;  %v453_v19 = vadd.f32 %v2190_v58, %v430_v12  ;;  %v482_v20 = vcombine.low %v450_v9, %v451_v13  ;;  %v432_v21 = vmul.f32 %v1855_v15, %v2168_v51  ;;  %v1822_v9 = vld [vmem:[%s2582_s5 + $0x68] sm:$0xff]   ;;  %v1825_v12 = vld [vmem:[%s2582_s5 + $0x20] sm:$0xff]   ;;  %v1826_v13 = vld [vmem:[%s2582_s5 + $0x58] sm:$0xff]  }
  0x28   : > { %708 = vmatprep.subr.bf16.mxu0 %v1791_v49  ;;  %v1859_v22 = vpop.eup %1858  ;;  %v433_v23 = vmul.f32 %v1857_v18, %v2168_v51  ;;  %v454_v28 = vadd.f32 %v2190_v58, %v431_v17  ;;  %780 = vmatpush1.bf16.msra.mxu1 %v1814_v10  ;;  %v1823_v10 = vld [vmem:[%s2582_s5 + $0x28] sm:$0xff]   ;;  %v1828_v15 = vld [vmem:[%s2582_s5 + $0x50] sm:$0xff]  }
  0x29   : > { %v1861_v25 = vpop.eup %1860  ;;  %v483_v26 = vcombine.low %v452_v16, %v453_v19  ;;  %v434_v27 = vmul.f32 %v1859_v22, %v2168_v51  ;;  %v455_v29 = vadd.f32 %v2190_v58, %v432_v21  ;;  %781 = vmatprep.subr.bf16.mxu1 %v1815_v14  ;;  %v1827_v14 = vld [vmem:[%s2582_s5 + $0x18] sm:$0xff]   ;;  %v1829_v16 = vld [vmem:[%s2582_s5 + $0x10] sm:$0xff]   ;;  %v1830_v17 = vld [vmem:[%s2582_s5 + $0x48] sm:$0xff]  }
  0x2a   : > { %v1863_v30 = vpop.eup %1862  ;;  %v456_v31 = vadd.f32 %v2190_v58, %v433_v23  ;;  %v435_v36 = vmul.f32 %v1861_v25, %v2168_v51  ;;  %v1831_v18 = vld [vmem:[%s2582_s5 + $0x8] sm:$0xff]   ;;  %v1832_v19 = vld [vmem:[%s2582_s5 + $0x40] sm:$0xff]  }
  0x2b   : > { %709 = vmatpush1.bf16.msra.mxu0 %v1795_v50  ;;  %v1865_v32 = vpop.eup %1864  ;;  %v498_v33 = vpack.c.bf16 %v483_v26, %v482_v20  ;;  %v457_v34 = vadd.f32 %v2190_v58, %v434_v27  ;;  %v436_v37 = vmul.f32 %v1863_v30, %v2168_v51  ;;  %v484_v38 = vcombine.low %v454_v28, %v455_v29  ;;  %v1833_v20 = vld [vmem:[%s2582_s5] sm:$0xff]  }
  0x2c   : > { %v1867_v35 = vpop.eup %1866  ;;  %v437_v40 = vmul.f32 %v1865_v32, %v2168_v51  ;;  %782 = vmatpush1.bf16.msra.mxu1 %v1817_v24  ;;  %v458_v44 = vadd.f32 %v2190_v58, %v435_v36  ;;  %1663 = vmatprep.subr.bf16.mxu0 %v1818_v7 }
  0x2d   : > { %v485_v39 = vcombine.low %v456_v31, %v457_v34  ;;  %v438_v41 = vmul.f32 %v1867_v35, %v2168_v51  ;;  %v1869_v42 = vpop.eup %1868  ;;  %v459_v45 = vadd.f32 %v2190_v58, %v436_v37 }
  0x2e   : > { %727 = vmatmul.mubr.bf16.vlgmr.msra.gmra.mxu0 %v498_v33  ;;  %v1871_v43 = vpop.eup %1870  ;;  %v460_v48 = vadd.f32 %v2190_v58, %v437_v40  ;;  %v439_v57 = vmul.f32 %v1869_v42, %v2168_v51 }
  0x2f   : > { %736 = vmatprep.mubr.bf16.mxu0 %v1980_v2  ;;  %v1873_v46 = vpop.eup %1872  ;;  %v499_v47 = vpack.c.bf16 %v485_v39, %v484_v38  ;;  %v461_v49 = vadd.f32 %v2190_v58, %v438_v41  ;;  %800 = vmatmul.mubr.bf16.vlgmr.msra.gmra.mxu1 %v498_v33  ;;  %v486_v52 = vcombine.low %v458_v44, %v459_v45 }
  0x30   : > { %v1875_v50 = vpop.eup %1874  ;;  %809 = vmatprep.mubr.bf16.mxu1 %v1980_v2  ;;  %v440_v60 = vmul.f32 %v1871_v43, %v2168_v51  ;;  %v441_v61 = vmul.f32 %v1873_v46, %v2168_v51  ;;  %v462_v63 = vadd.f32 %v2190_v58, %v439_v57 }
  0x31   : > { %v487_v59 = vcombine.low %v460_v48, %v461_v49  ;;  %v442_v62 = vmul.f32 %v1875_v50, %v2168_v51 }
  0x32   : > { %v463_v1 = vadd.f32 %v2190_v58, %v440_v60  ;;  %v464_v3 = vadd.f32 %v2190_v58, %v441_v61 }
  0x33   : > { %v500_v0 = vpack.c.bf16 %v487_v59, %v486_v52  ;;  %v465_v4 = vadd.f32 %v2190_v58, %v442_v62  ;;  %v1819_v58 = vld [vmem:[%s2582_s5 + $0x38] sm:$0xff]  }
  0x34   : > { %v488_v5 = vcombine.low %v462_v63, %v463_v1  ;;  %1664 = vmatpush3.bf16.msra.mxu0 %v1819_v58 }
  0x35   : > { %v489_v6 = vcombine.low %v464_v3, %v465_v4  ;;  %1665 = vmatprep.subr.bf16.mxu0 %v1820_v8 }
  0x36   : > { %737 = vmatmul.mubr.bf16.gmra.mxu0 %v499_v47 }
  0x37   : > { %746 = vmatprep.mubr.bf16.mxu0 %v1980_v2  ;;  %810 = vmatmul.mubr.bf16.gmra.mxu1 %v499_v47  ;;  %v501_v51 = vpack.c.bf16 %v489_v6, %v488_v5 }
  0x38   : > { %819 = vmatprep.mubr.bf16.mxu1 %v1980_v2 }
  0x3e   : > { %747 = vmatmul.mubr.bf16.gmra.mxu0 %v500_v0 }
  0x3f   : > { %756 = vmatprep.mubr.bf16.mxu0 %v1980_v2  ;;  %820 = vmatmul.mubr.bf16.gmra.mxu1 %v500_v0 }
  0x40   : > { %829 = vmatprep.mubr.bf16.mxu1 %v1980_v2  ;;  %v1821_v2 = vld [vmem:[%s2582_s5 + $0x30] sm:$0xff]  }
  0x41   : > { %1666 = vmatpush3.bf16.msra.mxu0 %v1821_v2 }
  0x42   : > { %1667 = vmatprep.subr.bf16.mxu0 %v1822_v9 }
  0x45   : > { %1668 = vmatpush3.bf16.msra.mxu0 %v1823_v10 }
  0x46   : > { %757 = vmatmul.mubr.bf16.gmra.mxu0 %v501_v51  ;;  %1669 = vmatprep.subr.bf16.mxu0 %v1824_v11 }
  0x47   : > { %830 = vmatmul.mubr.bf16.gmra.mxu1 %v501_v51 }
  0x49   : > { %1670 = vmatpush3.bf16.msra.mxu0 %v1825_v12 }
  0x4a   : > { %1671 = vmatprep.subr.bf16.mxu0 %v1826_v13 }
  0x4d   : > { %1672 = vmatpush3.bf16.msra.mxu0 %v1827_v14 }
  0x4e   : > { %1673 = vmatprep.subr.bf16.mxu0 %v1828_v15 }
  0x51   : > { %1674 = vmatpush3.bf16.msra.mxu0 %v1829_v16 }
  0x52   : > { %1675 = vmatprep.subr.bf16.mxu0 %v1830_v17 }
  0x55   : > { %1676 = vmatpush3.bf16.msra.mxu0 %v1831_v18 }
  0x56   : > { %1677 = vmatprep.subr.bf16.mxu0 %v1832_v19 }
  0x59   : > { %1678 = vmatpush3.bf16.msra.mxu0 %v1833_v20 }
  0xee   : > { %v2302_v21 = vpop.f32.mrf.mxu0 }
  0xef   : > { %v1614_v22 = vmul.f32 -1.442695, %v2302_v21  ;;  %v2311_v27 = vpop.f32.mrf.mxu1 }
  0xf0   : > { %v2305_v23 = vpop.f32.mrf.mxu0 }
  0xf1   : > { %1876 = vpow2.f32 %v1614_v22  ;;  %v1615_v24 = vmul.f32 -1.442695, %v2305_v23  ;;  %v2319_v32 = vpop.f32.mrf.mxu1 }
  0xf2   : > { %v2308_v25 = vpop.f32.mrf.mxu0 }
  0xf3   : > { %1878 = vpow2.f32 %v1615_v24  ;;  %v1616_v26 = vmul.f32 -1.442695, %v2308_v25  ;;  %v2327_v37 = vpop.f32.mrf.mxu1 }
  0xf4   : > { %v2313_v28 = vpop.f32.mrf.mxu0 }
  0xf5   : > { %1880 = vpow2.f32 %v1616_v26  ;;  %v1617_v29 = vmul.f32 -1.442695, %v2313_v28  ;;  %v2335_v44 = vpop.f32.mrf.mxu1 }
  0xf6   : > { %v2316_v30 = vpop.f32.mrf.mxu0 }
  0xf7   : > { %1882 = vpow2.f32 %v1617_v29  ;;  %v1618_v31 = vmul.f32 -1.442695, %v2316_v30  ;;  %v2343_v59 = vpop.f32.mrf.mxu1 }
  0xf8   : > { %v2321_v33 = vpop.f32.mrf.mxu0 }
  0xf9   : > { %1884 = vpow2.f32 %v1618_v31  ;;  %v1619_v34 = vmul.f32 -1.442695, %v2321_v33  ;;  %v2351_v5 = vpop.f32.mrf.mxu1 }
  0xfa   : > { %v2324_v35 = vpop.f32.mrf.mxu0 }
  0xfb   : > { %1886 = vpow2.f32 %v1619_v34  ;;  %v1620_v36 = vmul.f32 -1.442695, %v2324_v35  ;;  %v815_v11 = vpop.f32.mrf.mxu1 }
  0xfc   : > { %v2329_v38 = vpop.f32.mrf.mxu0 }
  0xfd   : > { %1888 = vpow2.f32 %v1620_v36  ;;  %v1621_v39 = vmul.f32 -1.442695, %v2329_v38  ;;  %v817_v18 = vpop.f32.mrf.mxu1 }
  0xfe   : > { %v1877_v40 = vpop.eup %1876  ;;  %v2332_v41 = vpop.f32.mrf.mxu0 }
  0xff   : > { %v888_v42 = vadd.f32 1.0, %v1877_v40  ;;  %1890 = vpow2.f32 %v1621_v39  ;;  %v1622_v43 = vmul.f32 -1.442695, %v2332_v41  ;;  %v2364_v36 = vpop.f32.mrf.mxu1 }
 0x100   : > { %v1879_v45 = vpop.eup %1878  ;;  %v2337_v46 = vpop.f32.mrf.mxu0 }
 0x101   : > { %1892 = vrcp.f32 %v888_v42  ;;  %v889_v47 = vadd.f32 1.0, %v1879_v45  ;;  %v1623_v48 = vmul.f32 -1.442695, %v2337_v46 }
 0x102   : > { %v1881_v49 = vpop.eup %1880  ;;  %1894 = vpow2.f32 %v1622_v43  ;;  %v2340_v50 = vpop.f32.mrf.mxu0 }
 0x103   : > { %1896 = vrcp.f32 %v889_v47  ;;  %v890_v52 = vadd.f32 1.0, %v1881_v49  ;;  %v1624_v57 = vmul.f32 -1.442695, %v2340_v50 }
 0x104   : > { %v1883_v60 = vpop.eup %1882  ;;  %1898 = vpow2.f32 %v1623_v48  ;;  %v2345_v61 = vpop.f32.mrf.mxu0 }
 0x105   : > { %1900 = vrcp.f32 %v890_v52  ;;  %v891_v62 = vadd.f32 1.0, %v1883_v60  ;;  %v1625_v63 = vmul.f32 -1.442695, %v2345_v61 }
 0x106   : > { %v1885_v0 = vpop.eup %1884  ;;  %1902 = vpow2.f32 %v1624_v57  ;;  %v2348_v1 = vpop.f32.mrf.mxu0 }
 0x107   : > { %1904 = vrcp.f32 %v891_v62  ;;  %v892_v3 = vadd.f32 1.0, %v1885_v0  ;;  %v1626_v4 = vmul.f32 -1.442695, %v2348_v1  ;;  %v823_v57 = vpop.f32.mrf.mxu1 }
 0x108   : > { %v1887_v6 = vpop.eup %1886  ;;  %1906 = vpow2.f32 %v1625_v63  ;;  %v2353_v51 = vpop.f32.mrf.mxu0 }
 0x109   : > { %1908 = vrcp.f32 %v892_v3  ;;  %v893_v7 = vadd.f32 1.0, %v1887_v6  ;;  %v1627_v58 = vmul.f32 -1.442695, %v2353_v51 }
 0x10a   : > { %v1889_v8 = vpop.eup %1888  ;;  %1910 = vpow2.f32 %v1626_v4  ;;  %v2356_v2 = vpop.f32.mrf.mxu0 }
 0x10b   : > { %1912 = vrcp.f32 %v893_v7  ;;  %v894_v9 = vadd.f32 1.0, %v1889_v8  ;;  %v1628_v10 = vmul.f32 -1.442695, %v2356_v2 }
 0x10c   : > { %v1891_v12 = vpop.eup %1890  ;;  %1914 = vpow2.f32 %v1627_v58  ;;  %v2359_v13 = vpop.f32.mrf.mxu0 }
 0x10d   : > { %1916 = vrcp.f32 %v894_v9  ;;  %v895_v14 = vadd.f32 1.0, %v1891_v12  ;;  %v1629_v15 = vmul.f32 -1.442695, %v2359_v13 }
 0x10e   : > { %v1893_v16 = vpop.eup %1892  ;;  %1918 = vpow2.f32 %v1628_v10 }
 0x10f   : > { %v1895_v17 = vpop.eup %1894  ;;  %1920 = vrcp.f32 %v895_v14  ;;  %v936_v40 = vmul.f32 %v1893_v16, %v2302_v21 }
 0x110   : > { %v1897_v19 = vpop.eup %1896  ;;  %1922 = vpow2.f32 %v1629_v15  ;;  %v896_v22 = vadd.f32 1.0, %v1895_v17 }
 0x111   : > { %v1899_v20 = vpop.eup %1898  ;;  %v937_v31 = vmul.f32 %v1897_v19, %v2305_v23  ;;  %v952_v21 = vmul.f32 %v936_v40, %v2311_v27 }
 0x112   : > { %v1901_v24 = vpop.eup %1900  ;;  %v897_v26 = vadd.f32 1.0, %v1899_v20 }
 0x113   : > { %v1903_v29 = vpop.eup %1902  ;;  %v938_v34 = vmul.f32 %v1901_v24, %v2308_v25  ;;  %v953_v23 = vmul.f32 %v937_v31, %v2319_v32  ;;  %v825_v32 = vpop.f32.mrf.mxu1 }
 0x114   : > { %v1905_v39 = vpop.eup %1904  ;;  %1924 = vrcp.f32 %v897_v26  ;;  %v898_v42 = vadd.f32 1.0, %v1903_v29 }
 0x115   : > { %v1907_v43 = vpop.eup %1906  ;;  %v939_v45 = vmul.f32 %v1905_v39, %v2313_v28  ;;  %1926 = vrcp.f32 %v896_v22  ;;  %v954_v49 = vmul.f32 %v938_v34, %v2327_v37  ;;  %v827_v15 = vpop.f32.mrf.mxu1 }
 0x116   : > { %v1909_v47 = vpop.eup %1908  ;;  %1928 = vrcp.f32 %v898_v42  ;;  %v899_v48 = vadd.f32 1.0, %v1907_v43 }
 0x117   : > { %v1911_v52 = vpop.eup %1910  ;;  %v955_v25 = vmul.f32 %v939_v45, %v2335_v44  ;;  %v968_v4 = vpack.c.bf16 %v954_v49, %v952_v21  ;;  %v940_v44 = vmul.f32 %v1909_v47, %v2316_v30  ;;  %v831_v22 = vpop.f32.mrf.mxu1  ;;  %v1837_v21 = vld [vmem:[%s2583_s6 + $0x20] sm:$0xff]  }
 0x118   : > { %v1913_v60 = vpop.eup %1912  ;;  %1930 = vrcp.f32 %v899_v48  ;;  %v900_v63 = vadd.f32 1.0, %v1911_v52 }
 0x119   : > { %v1915_v62 = vpop.eup %1914  ;;  %v969_v0 = vpack.c.bf16 %v955_v25, %v953_v23  ;;  %v941_v7 = vmul.f32 %v1913_v60, %v2321_v33  ;;  %v833_v29 = vpop.f32.mrf.mxu1 }
 0x11a   : > { %v1917_v28 = vpop.eup %1916  ;;  %v901_v3 = vadd.f32 1.0, %v1915_v62  ;;  %v1838_v62 = vld [vmem:[%s2583_s6 + $0x18] sm:$0xff]  }
 0x11b   : > { %v1919_v6 = vpop.eup %1918  ;;  %v942_v37 = vmul.f32 %v1917_v28, %v2324_v35  ;;  %1136 = vmatprep.mubr.bf16.mxu0 %v969_v0  ;;  %v957_v14 = vmul.f32 %v941_v7, %v2351_v5  ;;  %v956_v35 = vmul.f32 %v940_v44, %v2343_v59  ;;  %v1840_v0 = vld [vmem:[%s2583_s6 + $0x8] sm:$0xff]   ;;  %v1841_v28 = vld [vmem:[%s2583_s6] sm:$0xff]  }
 0x11c   : > { %v1921_v58 = vpop.eup %1920  ;;  %1932 = vrcp.f32 %v901_v3  ;;  %v902_v8 = vadd.f32 1.0, %v1919_v6  ;;  %1137 = vmatmul.mubr.bf16.vlgmr.msra.gmra.mxu0 %v968_v4 }
 0x11d   : > { %v1923_v27 = vpop.eup %1922  ;;  %v943_v9 = vmul.f32 %v1921_v58, %v2329_v38  ;;  %1934 = vrcp.f32 %v900_v63  ;;  %v958_v12 = vmul.f32 %v942_v37, %v815_v11  ;;  %v1839_v63 = vld [vmem:[%s2583_s6 + $0x10] sm:$0xff]  }
 0x11e   : > { %1936 = vrcp.f32 %v902_v8  ;;  %v903_v10 = vadd.f32 1.0, %v1923_v27 }
 0x11f   : > { %v959_v33 = vmul.f32 %v943_v9, %v817_v18  ;;  %v970_v19 = vpack.c.bf16 %v958_v12, %v956_v35 }
 0x120   : > { %1938 = vrcp.f32 %v903_v10 }
 0x121   : > { %v1925_v16 = vpop.eup %1924  ;;  %v971_v17 = vpack.c.bf16 %v959_v33, %v957_v14 }
 0x122   : > { %v1927_v30 = vpop.eup %1926  ;;  %v945_v38 = vmul.f32 %v1925_v16, %v2337_v46  ;;  %v835_v46 = vpop.f32.mrf.mxu1 }
 0x123   : > { %v1929_v20 = vpop.eup %1928  ;;  %1144 = vmatprep.mubr.bf16.mxu0 %v971_v17  ;;  %v944_v5 = vmul.f32 %v1927_v30, %v2332_v41 }
 0x124   : > { %v946_v24 = vmul.f32 %v1929_v20, %v2340_v50  ;;  %1145 = vmatmul.mubr.bf16.gmra.mxu0 %v970_v19  ;;  %v961_v59 = vmul.f32 %v945_v38, %v823_v57  ;;  %v837_v52 = vpop.f32.mrf.mxu1 }
 0x125   : > { %v1931_v11 = vpop.eup %1930  ;;  %v960_v39 = vmul.f32 %v944_v5, %v2364_v36 }
 0x126   : > { %v947_v18 = vmul.f32 %v1931_v11, %v2345_v61  ;;  %v962_v26 = vmul.f32 %v946_v24, %v825_v32 }
 0x128   : > { %v963_v31 = vmul.f32 %v947_v18, %v827_v15  ;;  %v972_v45 = vpack.c.bf16 %v962_v26, %v960_v39 }
 0x129   : > { %v1933_v34 = vpop.eup %1932 }
 0x12a   : > { %v1935_v40 = vpop.eup %1934  ;;  %v973_v42 = vpack.c.bf16 %v963_v31, %v961_v59  ;;  %v949_v50 = vmul.f32 %v1933_v34, %v2353_v51  ;;  %v1834_v51 = vld [vmem:[%s2583_s6 + $0x38] sm:$0xff]  }
 0x12b   : > { %v1937_v43 = vpop.eup %1936  ;;  %v948_v61 = vmul.f32 %v1935_v40, %v2348_v1  ;;  %v1835_v1 = vld [vmem:[%s2583_s6 + $0x30] sm:$0xff]  }
 0x12c   : > { %v950_v47 = vmul.f32 %v1937_v43, %v2356_v2  ;;  %1152 = vmatprep.mubr.bf16.mxu0 %v973_v42  ;;  %v965_v23 = vmul.f32 %v949_v50, %v833_v29  ;;  %v1981_v2 = vmov 0.0  }
 0x12d   : > { %v1939_v41 = vpop.eup %1938  ;;  %1153 = vmatmul.mubr.bf16.gmra.mxu0 %v972_v45  ;;  %v964_v25 = vmul.f32 %v948_v61, %v831_v22  ;;  %1715 = vmatprep.subr.bf16.mxu1 %v1981_v2 }
 0x12e   : > { %v951_v48 = vmul.f32 %v1939_v41, %v2359_v13  ;;  %v966_v49 = vmul.f32 %v950_v47, %v835_v46  ;;  %1716 = vmatpush3.bf16.msra.mxu1 %v1834_v51  ;;  %v1836_v13 = vld [vmem:[%s2583_s6 + $0x28] sm:$0xff]   ;;  %1731 = vmatprep.mubr.msk.bf16.mxu1 %vm1982_vm0, %v1981_v2 }
 0x12f   : > { %1717 = vmatprep.subr.bf16.mxu1 %v1981_v2 }
 0x130   : > { %v967_v36 = vmul.f32 %v951_v48, %v837_v52  ;;  %v974_v60 = vpack.c.bf16 %v966_v49, %v964_v25 }
 0x132   : > { %v975_v57 = vpack.c.bf16 %v967_v36, %v965_v23  ;;  %1718 = vmatpush3.bf16.msra.mxu1 %v1835_v1 }
 0x133   : > { %1719 = vmatprep.subr.bf16.mxu1 %v1981_v2 }
 0x134   : > { %1160 = vmatprep.mubr.bf16.mxu0 %v975_v57 }
 0x135   : > { %1161 = vmatmul.mubr.bf16.gmra.mxu0 %v974_v60 }
 0x136   : > { %1720 = vmatpush3.bf16.msra.mxu1 %v1836_v13 }
 0x137   : > { %1721 = vmatprep.subr.bf16.mxu1 %v1981_v2 }
 0x13a   : > { %1722 = vmatpush3.bf16.msra.mxu1 %v1837_v21 }
 0x13b   : > { %1723 = vmatprep.subr.bf16.mxu1 %v1981_v2 }
 0x13e   : > { %1724 = vmatpush3.bf16.msra.mxu1 %v1838_v62 }
 0x13f   : > { %1725 = vmatprep.subr.bf16.mxu1 %v1981_v2 }
 0x142   : > { %1726 = vmatpush3.bf16.msra.mxu1 %v1839_v63 }
 0x143   : > { %1727 = vmatprep.subr.bf16.mxu1 %v1981_v2 }
 0x146   : > { %1728 = vmatpush3.bf16.msra.mxu1 %v1840_v0 }
 0x147   : > { %1729 = vmatprep.subr.bf16.mxu1 %v1981_v2 }
 0x14a   : > { %1730 = vmatpush3.bf16.msra.mxu1 %v1841_v28 }
 0x14b   : > { %1735 = vmatprep.subr.bf16.mxu1 %v1981_v2 }
 0x1dc   : > { %v1679_v3 = vpop.f32.mrf.mxu0 }
 0x1de   : > { %v1680_v4 = vpop.f32.mrf.mxu0 }
 0x1df   : > { %v2422_v6 = vadd.f32 %v1680_v4, %v1679_v3 }
 0x1e0   : > { %v1682_v7 = vpop.f32.mrf.mxu0 }
 0x1e1   : > { %v2426_v37 = vcombine.high %v2422_v6, %v2422_v6  ;;  %v1194_v58 = vsel %vm1193_vm1, %v2422_v6, 0.0 }
 0x1e2   : > { %v1683_v32 = vpop.f32.mrf.mxu0 }
 0x1e3   : > { %v1195_v44 = vsel %vm1193_vm1, %v2426_v37, 0.0  ;;  %v2432_v8 = vadd.f32 %v1683_v32, %v1682_v7 }
 0x1e4   : > { %v1196_v27 = vadd.f32 %v1195_v44, %v1194_v58  ;;  %v1685_v9 = vpop.f32.mrf.mxu0  ;;  %v1842_v44 = vld [vmem:[%s2584_s7 + $0x8] sm:$0xff]  }
 0x1e5   : > { %v2436_v10 = vcombine.high %v2432_v8, %v2432_v8  ;;  %v1197_v12 = vsel %vm1193_vm1, %v2432_v8, 0.0 }
 0x1e6   : > { %v1198_v14 = vadd.f32 %v1197_v12, %v1196_v27  ;;  %v1686_v33 = vpop.f32.mrf.mxu0 }
 0x1e7   : > { %v1199_v15 = vsel %vm1193_vm1, %v2436_v10, 0.0  ;;  %v2442_v35 = vadd.f32 %v1686_v33, %v1685_v9  ;;  %v1843_v9 = vld [vmem:[%s2584_s7] sm:$0xff]  }
 0x1e8   : > { %v1200_v16 = vadd.f32 %v1199_v15, %v1198_v14  ;;  %v1688_v17 = vpop.f32.mrf.mxu0 }
 0x1e9   : > { %v2446_v30 = vcombine.high %v2442_v35, %v2442_v35  ;;  %v1201_v19 = vsel %vm1193_vm1, %v2442_v35, 0.0 }
 0x1ea   : > { %v1202_v20 = vadd.f32 %v1201_v19, %v1200_v16  ;;  %v1689_v22 = vpop.f32.mrf.mxu0 }
 0x1eb   : > { %v1203_v38 = vsel %vm1193_vm1, %v2446_v30, 0.0  ;;  %v2452_v24 = vadd.f32 %v1689_v22, %v1688_v17 }
 0x1ec   : > { %v1204_v11 = vadd.f32 %v1203_v38, %v1202_v20 }
 0x1ed   : > { %v2456_v5 = vcombine.high %v2452_v24, %v2452_v24  ;;  %v1205_v18 = vsel %vm1193_vm1, %v2452_v24, 0.0  ;;  %v1691_v26 = vpop.f32.mrf.mxu0 }
 0x1ee   : > { %v1206_v29 = vadd.f32 %v1205_v18, %v1204_v11 }
 0x1ef   : > { %v1207_v59 = vsel %vm1193_vm1, %v2456_v5, 0.0  ;;  %v1692_v31 = vpop.f32.mrf.mxu0 }
 0x1f0   : > { %v2462_v34 = vadd.f32 %v1692_v31, %v1691_v26  ;;  %v1208_v39 = vadd.f32 %v1207_v59, %v1206_v29  ;;  %v1658_v26 = vld [vmem:[%s2585_s8] ss:$0 sm:$0xff]  ;;  %v1945_v31 = vld [vmem:[%s2080_s13 + $0x4] sm:$0xf] }
 0x1f1   : > { %v1694_v40 = vpop.f32.mrf.mxu0  ;;  %v1944_v29 = vld [vmem:[%s2080_s13] sm:$0xf] }
 0x1f2   : > { %v2466_v42 = vcombine.high %v2462_v34, %v2462_v34  ;;  %v1209_v43 = vsel %vm1193_vm1, %v2462_v34, 0.0  ;;  %v1423_v59 = vmul.f32 %v1944_v29, %v1658_v26 }
 0x1f3   : > { %v1210_v45 = vadd.f32 %v1209_v43, %v1208_v39  ;;  %v1695_v46 = vpop.f32.mrf.mxu0  ;;  %v1424_v39 = vmul.f32 %v1945_v31, %v1658_v26 }
 0x1f4   : > { %v1211_v50 = vsel %vm1193_vm1, %v2466_v42, 0.0  ;;  %v2472_v47 = vadd.f32 %v1695_v46, %v1694_v40  ;;  %v1946_v40 = vld [vmem:[%s2080_s13 + $0x8] sm:$0xf] }
 0x1f5   : > { %v1212_v41 = vadd.f32 %v1211_v50, %v1210_v45  ;;  %v1697_v61 = vpop.f32.mrf.mxu0  ;;  %v1425_v43 = vmul.f32 %v1946_v40, %v1658_v26  ;;  %v1947_v45 = vld [vmem:[%s2080_s13 + $0xc] sm:$0xf]  ;;  %v1948_v50 = vld [vmem:[%s2080_s13 + $0x10] sm:$0xf] }
 0x1f6   : > { %v2476_v48 = vcombine.high %v2472_v47, %v2472_v47  ;;  %v1213_v49 = vsel %vm1193_vm1, %v2472_v47, 0.0  ;;  %v1426_v46 = vmul.f32 %v1947_v45, %v1658_v26 }
 0x1f7   : > { %v1214_v52 = vadd.f32 %v1213_v49, %v1212_v41  ;;  %v1698_v23 = vpop.f32.mrf.mxu0  ;;  %v1427_v41 = vmul.f32 %v1948_v50, %v1658_v26 }
 0x1f8   : > { %v1215_v36 = vsel %vm1193_vm1, %v2476_v48, 0.0  ;;  %v2482_v25 = vadd.f32 %v1698_v23, %v1697_v61  ;;  %v1949_v61 = vld [vmem:[%s2080_s13 + $0x14] sm:$0xf] }
 0x1f9   : > { %v1216_v57 = vadd.f32 %v1215_v36, %v1214_v52  ;;  %v1700_v60 = vpop.f32.mrf.mxu0  ;;  %v1428_v49 = vmul.f32 %v1949_v61, %v1658_v26  ;;  %v1950_v52 = vld [vmem:[%s2080_s13 + $0x18] sm:$0xf]  ;;  %v1951_v36 = vld [vmem:[%s2080_s13 + $0x1c] sm:$0xf] }
 0x1fa   : > { %v2486_v51 = vcombine.high %v2482_v25, %v2482_v25  ;;  %v1217_v1 = vsel %vm1193_vm1, %v2482_v25, 0.0  ;;  %v1429_v23 = vmul.f32 %v1950_v52, %v1658_v26 }
 0x1fb   : > { %v1218_v13 = vadd.f32 %v1217_v1, %v1216_v57  ;;  %v1701_v21 = vpop.f32.mrf.mxu0  ;;  %v1430_v57 = vmul.f32 %v1951_v36, %v1658_v26 }
 0x1fc   : > { %v1219_v62 = vsel %vm1193_vm1, %v2486_v51, 0.0  ;;  %v2492_v63 = vadd.f32 %v1701_v21, %v1700_v60  ;;  %v1952_v60 = vld [vmem:[%s2080_s13 + $0x20] sm:$0xf] }
 0x1fd   : > { %v1220_v0 = vadd.f32 %v1219_v62, %v1218_v13  ;;  %v1431_v1 = vmul.f32 %v1952_v60, %v1658_v26  ;;  %v1953_v13 = vld [vmem:[%s2080_s13 + $0x24] sm:$0xf]  ;;  %v1954_v62 = vld [vmem:[%s2080_s13 + $0x28] sm:$0xf] }
 0x1fe   : > { %v2496_v28 = vcombine.high %v2492_v63, %v2492_v63  ;;  %v1221_v3 = vsel %vm1193_vm1, %v2492_v63, 0.0  ;;  %v1432_v21 = vmul.f32 %v1953_v13, %v1658_v26 }
 0x1ff   : > { %v1222_v4 = vadd.f32 %v1221_v3, %v1220_v0  ;;  %v1433_v0 = vmul.f32 %v1954_v62, %v1658_v26  ;;  %v1955_v3 = vld [vmem:[%s2080_s13 + $0x2c] sm:$0xf]  ;;  %s1662_s13 = sshll.u32 %s2592_s30, 5 }
 0x200   : > { %v1223_v7 = vsel %vm1193_vm1, %v2496_v28, 0.0  ;;  %s2550_s14 = scalar_lea.vmem %s2586_s9, %s1662_s13 }
 0x201   : > { %v1224_v32 = vadd.f32 %v1223_v7, %v1222_v4  ;;  %v1434_v4 = vmul.f32 %v1955_v3, %v1658_v26 }
 0x203   : > { %v1226_v58 = vmul.f32 0.0625, %v1224_v32  ;;  %v1435_v32 = vmul.f32 %v1658_v26, %v2174_v53 }
 0x205   : > { %v1227_v27 = vpack.c.bf16 %v1226_v58, %v1226_v58  ;;  %v1436_v58 = vmul.f32 %v1658_v26, %v2177_v54 }
 0x207   : > { %1732 = vmatmul.mubr.bf16.vlgmr.msra.gmra.mxu1 %v1227_v27  ;;  %v1438_v27 = vmul.f32 %v1658_v26, %v2183_v56 }
 0x208   : > { %1736 = vmatpush3.bf16.msra.mxu1 %v1842_v44  ;;  %1739 = vmatprep.mubr.msk.bf16.mxu1 %vm1982_vm0, %v1981_v2  ;;  %v1437_v44 = vmul.f32 %v1658_v26, %v2180_v55 }
 0x209   : > { %1737 = vmatprep.subr.bf16.mxu1 %v1981_v2 }
 0x20c   : > { %1738 = vmatpush3.bf16.msra.mxu1 %v1843_v9 }
 0x2c7   : > { %v1326_v12 = vpop.f32.mrf.mxu1 }
 0x2c8   : > { %v1332_v14 = vmax.f32 %v1326_v12, 0.0 }
 0x2c9   : > { %v1733_v33 = vpop.f32.mrf.mxu1 }
 0x2ca   : > { %v1333_v15 = vpack.c.bf16 %v1332_v14, %v1332_v14 }
 0x2cb   : > { %v1329_v16 = vpop.f32.mrf.mxu1 }
 0x2cc   : > { %1740 = vmatmul.mubr.msk.bf16.vlgmr.msra.gmra.mxu1 %vm1350_vm2, %v1333_v15 }
 0x2cd   : > { %v1734_v17 = vpop.f32.mrf.mxu1 }
 0x38c   : > { %v1388_v19 = vpop.f32.mrf.mxu1 }
 0x38d   : > { %v1657_v20 = vmul.f32 -1.442695, %v1388_v19 }
 0x38e   : > { %v1741_v2 = vpop.f32.mrf.mxu1 }
 0x38f   : > { %1940 = vpow2.f32 %v1657_v20 }
 0x390   : > { %v1391_v22 = vpop.f32.mrf.mxu1 }
 0x392   : > { %v1742_v38 = vpop.f32.mrf.mxu1 }
 0x39c   : > { %v1941_v11 = vpop.eup %1940 }
 0x39d   : > { %v1397_v18 = vadd.f32 1.0, %v1941_v11 }
 0x39f   : > { %1942 = vrcp.f32 %v1397_v18 }
 0x3ac   : > { %v1943_v7 = vpop.eup %1942 }
 0x3ad   : > { %v1400_v9 = vmul.f32 %v1943_v7, %v2422_v6  ;;  %v1401_v12 = vmul.f32 %v1943_v7, %v2426_v37  ;;  %v1402_v14 = vmul.f32 %v1943_v7, %v2432_v8  ;;  %v1403_v33 = vmul.f32 %v1943_v7, %v2436_v10 }
 0x3ae   : > { %v1404_v15 = vmul.f32 %v1943_v7, %v2442_v35  ;;  %v1405_v16 = vmul.f32 %v1943_v7, %v2446_v30  ;;  %v1406_v53 = vmul.f32 %v1943_v7, %v2452_v24  ;;  %v1407_v54 = vmul.f32 %v1943_v7, %v2456_v5 }
 0x3af   : > { %v1408_v55 = vmul.f32 %v1943_v7, %v2462_v34  ;;  %v1409_v56 = vmul.f32 %v1943_v7, %v2466_v42  ;;  %v1410_v6 = vmul.f32 %v1943_v7, %v2472_v47  ;;  %v1411_v37 = vmul.f32 %v1943_v7, %v2476_v48 }
 0x3b0   : > { %v1412_v8 = vmul.f32 %v1943_v7, %v2482_v25  ;;  %v1413_v10 = vmul.f32 %v1943_v7, %v2486_v51  ;;  %v1414_v35 = vmul.f32 %v1943_v7, %v2492_v63  ;;  %v1415_v30 = vmul.f32 %v1943_v7, %v2496_v28 }
 0x3b1   : > { %v1439_v24 = vadd.f32 %v1423_v59, %v1400_v9  ;;  %v1440_v17 = vadd.f32 %v1424_v39, %v1401_v12  ;;  %v1441_v5 = vadd.f32 %v1425_v43, %v1402_v14  ;;  %v1442_v19 = vadd.f32 %v1426_v46, %v1403_v33 }
 0x3b2   : > { %v1443_v34 = vadd.f32 %v1427_v41, %v1404_v15  ;;  %v1444_v20 = vadd.f32 %v1428_v49, %v1405_v16  ;;  %v1445_v42 = vadd.f32 %v1429_v23, %v1406_v53  ;;  %v1446_v2 = vadd.f32 %v1430_v57, %v1407_v54 }
 0x3b3   : > { %v1447_v47 = vadd.f32 %v1431_v1, %v1408_v55  ;;  %v1448_v22 = vadd.f32 %v1432_v21, %v1409_v56  ;;  %v1449_v48 = vadd.f32 %v1433_v0, %v1410_v6  ;;  %v1450_v38 = vadd.f32 %v1434_v4, %v1411_v37 }
 0x3b4   : > { %v1451_v25 = vadd.f32 %v1435_v32, %v1412_v8  ;;  %v1452_v51 = vadd.f32 %v1436_v58, %v1413_v10  ;;  %v1453_v63 = vadd.f32 %v1437_v44, %v1414_v35  ;;  %v1454_v28 = vadd.f32 %v1438_v27, %v1415_v30 }
 0x3b5   : > { %v1455_v11 = vpack.c.bf16 %v1439_v24, %v1439_v24  ;;  %v1456_v18 = vpack.c.bf16 %v1440_v17, %v1440_v17  ;;  %v1457_v26 = vpack.c.bf16 %v1441_v5, %v1441_v5  ;;  %v1458_v29 = vpack.c.bf16 %v1442_v19, %v1442_v19 }
 0x3b6   : > { %v1459_v59 = vpack.c.bf16 %v1443_v34, %v1443_v34  ;;  %v1460_v31 = vpack.c.bf16 %v1444_v20, %v1444_v20  ;;  %v1461_v39 = vpack.c.bf16 %v1445_v42, %v1445_v42  ;;  %v1462_v40 = vpack.c.bf16 %v1446_v2, %v1446_v2 }
 0x3b7   : > { %v1463_v43 = vpack.c.bf16 %v1447_v47, %v1447_v47  ;;  %v1464_v45 = vpack.c.bf16 %v1448_v22, %v1448_v22  ;;  %v1465_v46 = vpack.c.bf16 %v1449_v48, %v1449_v48  ;;  %v1466_v50 = vpack.c.bf16 %v1450_v38, %v1450_v38  ;;  %1471 = vst [vmem:[%s2550_s14] sm:$0x3] %v1455_v11 }
 0x3b8   : > { %1472 = vst [vmem:[%s2550_s14 + $0x2] sm:$0x3] %v1456_v18  ;;  %1473 = vst [vmem:[%s2550_s14 + $0x4] sm:$0x3] %v1457_v26  ;;  %v1467_v41 = vpack.c.bf16 %v1451_v25, %v1451_v25  ;;  %v1468_v61 = vpack.c.bf16 %v1452_v51, %v1452_v51  ;;  %v1469_v49 = vpack.c.bf16 %v1453_v63, %v1453_v63 }
 0x3b9   : > { %1474 = vst [vmem:[%s2550_s14 + $0x6] sm:$0x3] %v1458_v29  ;;  %v1470_v52 = vpack.c.bf16 %v1454_v28, %v1454_v28  ;;  %1475 = vst [vmem:[%s2550_s14 + $0x8] sm:$0x3] %v1459_v59 }
 0x3ba   : > { %1476 = vst [vmem:[%s2550_s14 + $0xa] sm:$0x3] %v1460_v31  ;;  %1477 = vst [vmem:[%s2550_s14 + $0xc] sm:$0x3] %v1461_v39 }
 0x3bb   : > { %1478 = vst [vmem:[%s2550_s14 + $0xe] sm:$0x3] %v1462_v40  ;;  %1479 = vst [vmem:[%s2550_s14 + $0x10] sm:$0x3] %v1463_v43 }
 0x3bc   : > { %1480 = vst [vmem:[%s2550_s14 + $0x12] sm:$0x3] %v1464_v45  ;;  %1481 = vst [vmem:[%s2550_s14 + $0x14] sm:$0x3] %v1465_v46 }
 0x3bd   : > { %1482 = vst [vmem:[%s2550_s14 + $0x16] sm:$0x3] %v1466_v50  ;;  %1483 = vst [vmem:[%s2550_s14 + $0x18] sm:$0x3] %v1467_v41 }
 0x3be   : > { %1484 = vst [vmem:[%s2550_s14 + $0x1a] sm:$0x3] %v1468_v61  ;;  %1485 = vst [vmem:[%s2550_s14 + $0x1c] sm:$0x3] %v1469_v49 }
 0x3bf   : > { %1486 = vst [vmem:[%s2550_s14 + $0x1e] sm:$0x3] %v1470_v52 }
 0x3c0 PF: > { %s19_s11 = sadd.s32 1, %s1978_s11   ;;  %s2587_s30 = smov %s1974_s10 }
 0x3c1   : > { %p16_p5 = scmp.ge.s32.totalorder %s19_s11, 4   ;;  %s2588_s10 = smov %s2590_s12 }
 0x3c3   :  { %18 = sbr.rel (!%p16_p5) target bundleno = 2 (0x2), region = 86 }

</bundles_post_ra>
